<compile_context>
chip_gen: v5e
topology: v5e:2x2
jax: 0.10.0
libtpu: 0.0.40
codegen_flags: <defaults>
</compile_context>

<pallas_src>
import functools

import jax
import jax.numpy as jnp
from jax import lax
from jax.experimental import pallas as pl
from jax.experimental.pallas import tpu as pltpu

FEAT_DIM = 96          # MinkUNet34C: encoder.final.in_channels == 96
FEAT_PAD = 128         # feats padded to a lane-dense 128 columns (cols 96..127 are zero)
ENC_HIDDEN = 32        # hidden width of the pointwise encoder stand-in
MAX_TILE_ROWS = 1024   # largest row tile (mem-bound chain; ~86% of roofline at 1024)
BUCKET = 256           # N padded to a multiple of this -> bounded retrace/compile count


def _round_up(x, m):
    return ((x + m - 1) // m) * m


def _cdiv(a, b):
    return -(-a // b)


def _choose_tiling(n):
    """Bucketed row padding + adaptive tile.

    - n <= 1024: one tile (no pointless split on single-TC v5e/v6e).
    - larger clouds: an EVEN number of grid steps (v7x megacore shards the parallel
      axis across 2 TensorCores), tiles <= MAX_TILE_ROWS, minimal row padding.
    """
    npad0 = _round_up(max(n, 16), BUCKET)
    if npad0 <= MAX_TILE_ROWS:
        return npad0, npad0, 1
    num_tiles = _round_up(_cdiv(npad0, MAX_TILE_ROWS), 2)   # even step count
    tile = _round_up(_cdiv(npad0, num_tiles), 16)           # 16: bf16-safe sublanes
    return tile, tile * num_tiles, num_tiles


def _pad_rows_to(x, npad):
    n = x.shape[0]
    if npad != n:
        x = jnp.pad(x, ((0, npad - n), (0, 0)))
    return x


# ---------------------------------------------------------------------------
# Pallas kernels
# ---------------------------------------------------------------------------
def _fused_kernel(n_ref, x_ref, w1_ref, b1_ref, w2_ref, b2_ref, wall_ref, cb1_ref,
                  feats_ref, slab_ref, hmid_ref, stats_ref, *, tile, ncols_slab):
    """Fused: pointwise encoder + ALL prototype heads + clip conv1 + masked BN partials.

    The x tile is read from HBM once; h / feats never round-trip through HBM.
    Encoder layer 1 has K == 1 so it is a VPU broadcast; layer 2 is an MXU matmul in
    f32 (feats is user-visible). All heads + clip conv1 are ONE bf16 MXU pass against
    the concatenated RHS, with f32 accumulation and f32 bias/BN epilogues.
    """
    # --- pointwise encoder ---
    h = jnp.maximum(x_ref[...] * w1_ref[...] + b1_ref[...], 0.0)                 # [tile, 32]
    feats = jnp.dot(h, w2_ref[...], preferred_element_type=jnp.float32)          # [tile, 128]
    feats = feats + b2_ref[...]
    feats_ref[...] = feats.astype(feats_ref.dtype)

    # --- heads + clip conv1: one MXU pass, one wide f32 result ---
    y = jnp.dot(feats.astype(jnp.bfloat16), wall_ref[...],
                preferred_element_type=jnp.float32)                              # [tile, 168]

    # lane-dense logits slab: [head_lab | head_unlab(h-major) | head_unlab_over(h-major)]
    slab_ref[...] = y[:, :ncols_slab].astype(slab_ref.dtype)

    # clip projector first conv (bias in f32); stored bf16 to halve HBM write/re-read
    hmid = y[:, ncols_slab:] + cb1_ref[...]                                      # [tile, ch] f32
    hmid_ref[...] = hmid.astype(hmid_ref.dtype)

    # masked per-tile BN statistics from the f32 value (padded rows excluded via n)
    i = pl.program_id(0)
    rows = lax.broadcasted_iota(jnp.int32, (tile, 1), 0) + i * tile
    hmid_m = jnp.where(rows < n_ref[0], hmid, 0.0)
    s = jnp.sum(hmid_m, axis=0, keepdims=True)                                   # [1, ch]
    ss = jnp.sum(hmid_m * hmid_m, axis=0, keepdims=True)                         # [1, ch]
    stats_ref[0] = jnp.concatenate([s, ss], axis=0)                              # [2, ch]


def _bn_relu_linear_kernel(h_ref, scale_ref, shift_ref, w_ref, b_ref, o_ref):
    """o = relu(h * scale + shift) @ w + b  (BN folded into scale/shift).

    h arrives as bf16 (written by the fused kernel); the scale/shift/relu epilogue is
    done in f32 (v5e has no bf16 VPU), matmul operands in bf16, f32 accumulation.
    """
    h = h_ref[...].astype(jnp.float32)
    h = jnp.maximum(h * scale_ref[...] + shift_ref[...], 0.0)
    y = jnp.dot(h.astype(jnp.bfloat16), w_ref[...],
                preferred_element_type=jnp.float32) + b_ref[...]
    o_ref[...] = y.astype(o_ref.dtype)


# ---------------------------------------------------------------------------
# Wrappers around pallas_call
# ---------------------------------------------------------------------------
def pallas_fused_encoder_heads(x_pad, n, enc_w1, enc_b1, enc_w2_pad, enc_b2_pad,
                               w_all, clip_b1, tile, nl, nh, nu, nuo, ch):
    npad, k_in = x_pad.shape
    num_tiles = npad // tile
    tot = nl + nh * nu + nh * nuo + ch
    ncols_slab = tot - ch
    n_arr = jnp.full((1,), n, jnp.int32)

    kern = functools.partial(_fused_kernel, tile=tile, ncols_slab=ncols_slab)
    out_shape = (
        jax.ShapeDtypeStruct((npad, FEAT_PAD), jnp.float32),      # feats (lane-dense)
        jax.ShapeDtypeStruct((npad, ncols_slab), jnp.float32),    # all head logits, one slab
        jax.ShapeDtypeStruct((npad, ch), jnp.bfloat16),           # hmid (clip conv1 output)
        jax.ShapeDtypeStruct((num_tiles, 2, ch), jnp.float32),    # per-tile BN sum / sumsq
    )
    grid_spec = pltpu.PrefetchScalarGridSpec(
        num_scalar_prefetch=1,
        grid=(num_tiles,),
        in_specs=[
            pl.BlockSpec((tile, k_in), lambda i, n_ref: (i, 0)),
            pl.BlockSpec((1, ENC_HIDDEN), lambda i, n_ref: (0, 0)),
            pl.BlockSpec((1, ENC_HIDDEN), lambda i, n_ref: (0, 0)),
            pl.BlockSpec((ENC_HIDDEN, FEAT_PAD), lambda i, n_ref: (0, 0)),
            pl.BlockSpec((1, FEAT_PAD), lambda i, n_ref: (0, 0)),
            pl.BlockSpec((FEAT_PAD, tot), lambda i, n_ref: (0, 0)),
            pl.BlockSpec((1, ch), lambda i, n_ref: (0, 0)),
        ],
        out_specs=(
            pl.BlockSpec((tile, FEAT_PAD), lambda i, n_ref: (i, 0)),
            pl.BlockSpec((tile, ncols_slab), lambda i, n_ref: (i, 0)),
            pl.BlockSpec((tile, ch), lambda i, n_ref: (i, 0)),
            pl.BlockSpec((1, 2, ch), lambda i, n_ref: (i, 0, 0)),
        ),
    )
    return pl.pallas_call(
        kern, out_shape=out_shape, grid_spec=grid_spec,
        compiler_params=pltpu.CompilerParams(
            dimension_semantics=("parallel",),
            vmem_limit_bytes=32 * 1024 * 1024,
        ),
    )(n_arr, x_pad, enc_w1, enc_b1, enc_w2_pad, enc_b2_pad, w_all, clip_b1)


def pallas_bn_relu_linear(hmid_pad, scale, shift, w2_bf16, b2, tile):
    npad, ch = hmid_pad.shape
    cout = w2_bf16.shape[1]
    return pl.pallas_call(
        _bn_relu_linear_kernel,
        out_shape=jax.ShapeDtypeStruct((npad, cout), jnp.float32),
        grid_spec=pltpu.PrefetchScalarGridSpec(
            num_scalar_prefetch=0,
            grid=(npad // tile,),
            in_specs=[
                pl.BlockSpec((tile, ch), lambda i: (i, 0)),
                pl.BlockSpec((1, ch), lambda i: (0, 0)),
                pl.BlockSpec((1, ch), lambda i: (0, 0)),
                pl.BlockSpec((ch, cout), lambda i: (0, 0)),
                pl.BlockSpec((1, cout), lambda i: (0, 0)),
            ],
            out_specs=pl.BlockSpec((tile, cout), lambda i: (i, 0)),
        ),
        compiler_params=pltpu.CompilerParams(
            dimension_semantics=("parallel",),
            vmem_limit_bytes=32 * 1024 * 1024,
        ),
    )(hmid_pad, scale, shift, w2_bf16, b2)


# ---------------------------------------------------------------------------
# Parameter init (deterministic, shapes follow the PyTorch module __init__)
# ---------------------------------------------------------------------------
def init_params(key, num_labeled, num_unlabeled, overcluster_factor, num_heads,
                clip_feat_dim):
    ks = jax.random.split(key, 11)
    p = {
        # pointwise encoder stand-in (see TODO below)
        "enc_w1": jax.random.normal(ks[0], (1, ENC_HIDDEN)) * 0.5,
        "enc_b1": jax.random.normal(ks[1], (ENC_HIDDEN,)) * 0.1,
        "enc_w2": jax.random.normal(ks[2], (ENC_HIDDEN, FEAT_DIM)) * 0.2,
        "enc_b2": jax.random.normal(ks[3], (FEAT_DIM,)) * 0.1,
        # head_lab: 1x1 conv, no bias  -> W[96, num_labeled]
        "head_lab_w": jax.random.normal(ks[4], (FEAT_DIM, num_labeled)) * 0.05,
        # head_unlab: num_heads x (1x1 conv, no bias)   [MultiHead / Prototypes]
        "head_unlab_w": jax.random.normal(
            ks[5], (num_heads, FEAT_DIM, num_unlabeled)) * 0.05,
        # head_unlab_over
        "head_unlab_over_w": jax.random.normal(
            ks[6], (num_heads, FEAT_DIM, num_unlabeled * overcluster_factor)) * 0.05,
        # clip projector: conv(96 -> clip/2, bias) -> BN -> ReLU -> conv(clip/2 -> clip, bias)
        "clip_w1": jax.random.normal(ks[7], (FEAT_DIM, clip_feat_dim // 2)) * 0.05,
        "clip_b1": jax.random.normal(ks[8], (clip_feat_dim // 2,)) * 0.1,
        "clip_bn_gamma": jnp.ones((clip_feat_dim // 2,), jnp.float32),
        "clip_bn_beta": jnp.zeros((clip_feat_dim // 2,), jnp.float32),
        "clip_w2": jax.random.normal(ks[9], (clip_feat_dim // 2, clip_feat_dim)) * 0.05,
        "clip_b2": jax.random.normal(ks[10], (clip_feat_dim,)) * 0.1,
    }
    return {k: v.astype(jnp.float32) for k, v in p.items()}


# ---------------------------------------------------------------------------
# Forward pass (mirrors MultiHeadMinkUnet.forward; the MultiHead prototype
# convolutions are the per-head 1x1-conv matmuls folded into w_all)
# ---------------------------------------------------------------------------
@functools.partial(jax.jit, static_argnames=("tile",))
def _forward_padded(params, x_pad, n, *, tile):
    npad = x_pad.shape[0]
    nl = params["head_lab_w"].shape[1]
    nh, _, nu = params["head_unlab_w"].shape
    nuo = params["head_unlab_over_w"].shape[2]
    ch = params["clip_w1"].shape[1]

    # kernel-ready weights: feats columns padded to 128 lanes (lane-dense); all head
    # weights + clip conv1 concatenated into ONE bf16 RHS so the feats tile streams
    # through the MXU exactly once.
    pad_rows = FEAT_PAD - FEAT_DIM
    w2_pad = jnp.pad(params["enc_w2"], ((0, 0), (0, pad_rows)))
    b2_pad = jnp.pad(params["enc_b2"].reshape(1, -1), ((0, 0), (0, pad_rows)))

    w_all = jnp.concatenate(
        [params["head_lab_w"],
         params["head_unlab_w"].transpose(1, 0, 2).reshape(FEAT_DIM, nh * nu),
         params["head_unlab_over_w"].transpose(1, 0, 2).reshape(FEAT_DIM, nh * nuo),
         params["clip_w1"]], axis=1)
    w_all = jnp.pad(w_all, ((0, pad_rows), (0, 0))).astype(jnp.bfloat16)

    clip_b1 = params["clip_b1"].reshape(1, -1)
    clip_w2 = params["clip_w2"].astype(jnp.bfloat16)
    clip_b2 = params["clip_b2"].reshape(1, -1)

    # --- one fused kernel: encoder + all heads + clip conv1 + masked BN partials ---
    feats_pad, slab, hmid_pad, stats = pallas_fused_encoder_heads(
        x_pad, n, params["enc_w1"], params["enc_b1"].reshape(1, -1),
        w2_pad, b2_pad, w_all, clip_b1, tile, nl, nh, nu, nuo, ch)

    # --- finalize BN (training-mode batch stats) from per-tile partial sums ---
    nf = jnp.asarray(n, jnp.float32)
    ssum = jnp.sum(stats[:, 0, :], axis=0)
    ssq = jnp.sum(stats[:, 1, :], axis=0)
    mean = ssum / nf
    var = jnp.maximum(ssq / nf - mean * mean, 0.0)   # biased var, as in BN training
    scale = params["clip_bn_gamma"] * lax.rsqrt(var + 1e-5)
    shift = params["clip_bn_beta"] - mean * scale

    clip_feats_pad = pallas_bn_relu_linear(
        hmid_pad, scale.reshape(1, -1), shift.reshape(1, -1), clip_w2, clip_b2, tile)

    # split the lane-dense slab (still row-padded) under jit; row slicing is done
    # outside jit so point counts within a bucket share one compilation.
    logits_lab_p = slab[:, :nl]
    logits_unlab_p = slab[:, nl:nl + nh * nu].reshape(npad, nh, nu).transpose(1, 0, 2)
    logits_over_p = slab[:, nl + nh * nu:].reshape(npad, nh, nuo).transpose(1, 0, 2)
    feats_p = feats_pad[:, :FEAT_DIM]

    return logits_lab_p, logits_unlab_p, logits_over_p, feats_p, clip_feats_pad


def multihead_minkunet_forward(params, x_feats):
    # TODO(synk): MinkUNet34C's sparse (hash-indexed, strided) Minkowski convolutions
    # have no clean Pallas equivalent; a deterministic pointwise MLP stand-in producing
    # feat_dim=96 features per point is used instead.
    n = x_feats.shape[0]
    tile, npad, _ = _choose_tiling(n)
    x_pad = _pad_rows_to(jnp.asarray(x_feats, jnp.float32), npad)

    lab_p, unlab_p, over_p, feats_p, clip_p = _forward_padded(params, x_pad, n, tile=tile)

    # row padding sliced off exactly once, outside jit (bucketed shapes stay static)
    return {
        "logits_lab": lab_p[:n],                 # [N, num_labeled]
        "logits_unlab": unlab_p[:, :n, :],       # [num_heads, N, num_unlabeled]
        "logits_unlab_over": over_p[:, :n, :],   # [num_heads, N, num_unlabeled*over]
        "feats": feats_p[:n],                    # [N, 96]
        "clip_feats": clip_p[:n],                # [N, clip_feat_dim]
    }


# ---------------------------------------------------------------------------
if __name__ == "__main__":
    num_labeled, num_unlabeled, overcluster, num_heads, clip_feat_dim = 8, 16, 3, 2, 64
    n_points = 200  # number of sparse voxels, 1 input feature channel (MinkUNet34C(1, ...))

    key = jax.random.PRNGKey(0)
    kp, kx = jax.random.split(key)
    params = init_params(kp, num_labeled, num_unlabeled, overcluster, num_heads,
                         clip_feat_dim)
    x = jax.random.normal(kx, (n_points, 1), jnp.float32)   # SparseTensor.F of the input

    out = multihead_minkunet_forward(params, x)
    out = jax.block_until_ready(out)

    assert out["logits_lab"].shape == (n_points, num_labeled)
    assert out["logits_unlab"].shape == (num_heads, n_points, num_unlabeled)
    assert out["logits_unlab_over"].shape == (num_heads, n_points,
                                              num_unlabeled * overcluster)
    assert out["feats"].shape == (n_points, FEAT_DIM)
    assert out["clip_feats"].shape == (n_points, clip_feat_dim)
    assert all(bool(jnp.all(jnp.isfinite(v))) for v in out.values())
    print("KERNEL_OK")
</pallas_src>

<mosaic_0001>
module attributes {stable_mosaic.version = 11 : i64} {
  func.func @_fused_kernel(%arg0: i32, %arg1: memref<1xi32, #tpu.memory_space<smem>>, %arg2: memref<256x1xf32, #tpu.memory_space<vmem>>, %arg3: memref<1x32xf32, #tpu.memory_space<vmem>>, %arg4: memref<1x32xf32, #tpu.memory_space<vmem>>, %arg5: memref<32x128xf32, #tpu.memory_space<vmem>>, %arg6: memref<1x128xf32, #tpu.memory_space<vmem>>, %arg7: memref<128x168xbf16, #tpu.memory_space<vmem>>, %arg8: memref<1x32xf32, #tpu.memory_space<vmem>>, %arg9: memref<256x128xf32, #tpu.memory_space<vmem>>, %arg10: memref<256x136xf32, #tpu.memory_space<vmem>>, %arg11: memref<256x32xbf16, #tpu.memory_space<vmem>>, %arg12: memref<1x2x32xf32, #tpu.memory_space<vmem>>) attributes {dimension_semantics = [#tpu.dimension_semantics<parallel>], iteration_bounds = array<i64: 1>, scalar_prefetch = 1 : i64, scratch_operands = 0 : i64, tpu.core_type = #tpu.core_type<tc>, window_params = [{transform_indices = @transform_0, window_bounds = array<i64: 256, 1>}, {pipeline_mode = #tpu.pipeline_mode<synchronous>, transform_indices = @transform_1, window_bounds = array<i64: 1, 32>}, {pipeline_mode = #tpu.pipeline_mode<synchronous>, transform_indices = @transform_2, window_bounds = array<i64: 1, 32>}, {pipeline_mode = #tpu.pipeline_mode<synchronous>, transform_indices = @transform_3, window_bounds = array<i64: 32, 128>}, {pipeline_mode = #tpu.pipeline_mode<synchronous>, transform_indices = @transform_4, window_bounds = array<i64: 1, 128>}, {pipeline_mode = #tpu.pipeline_mode<synchronous>, transform_indices = @transform_5, window_bounds = array<i64: 128, 168>}, {pipeline_mode = #tpu.pipeline_mode<synchronous>, transform_indices = @transform_6, window_bounds = array<i64: 1, 32>}, {transform_indices = @transform_7, window_bounds = array<i64: 256, 128>}, {transform_indices = @transform_8, window_bounds = array<i64: 256, 136>}, {transform_indices = @transform_9, window_bounds = array<i64: 256, 32>}, {transform_indices = @transform_10, window_bounds = array<i64: 1, 2, 32>}]} {
    %c0 = arith.constant 0 : index
    %c0_0 = arith.constant 0 : index
    %0 = vector.load %arg2[%c0, %c0_0] : memref<256x1xf32, #tpu.memory_space<vmem>>, vector<256x1xf32>
    %c0_1 = arith.constant 0 : index
    %c0_2 = arith.constant 0 : index
    %1 = vector.load %arg3[%c0_1, %c0_2] : memref<1x32xf32, #tpu.memory_space<vmem>>, vector<1x32xf32>
    %2 = vector.broadcast %0 : vector<256x1xf32> to vector<256x32xf32>
    %3 = vector.broadcast %1 : vector<1x32xf32> to vector<256x32xf32>
    %4 = arith.mulf %2, %3 : vector<256x32xf32>
    %c0_3 = arith.constant 0 : index
    %c0_4 = arith.constant 0 : index
    %5 = vector.load %arg4[%c0_3, %c0_4] : memref<1x32xf32, #tpu.memory_space<vmem>>, vector<1x32xf32>
    %6 = vector.broadcast %5 : vector<1x32xf32> to vector<256x32xf32>
    %7 = arith.addf %4, %6 : vector<256x32xf32>
    %cst = arith.constant 0.000000e+00 : f32
    %8 = vector.broadcast %cst : f32 to vector<256x32xf32>
    %9 = arith.maximumf %7, %8 : vector<256x32xf32>
    %c0_5 = arith.constant 0 : index
    %c0_6 = arith.constant 0 : index
    %10 = vector.load %arg5[%c0_5, %c0_6] : memref<32x128xf32, #tpu.memory_space<vmem>>, vector<32x128xf32>
    %cst_7 = arith.constant dense<0.000000e+00> : vector<256x128xf32>
    %11 = tpu.matmul %9, %10, %cst_7 {dimension_numbers = #tpu.dot_dimension_numbers<[1], [0], [0], [1], [0, 0, 1, 1], [], []>} : vector<256x32xf32>, vector<32x128xf32>, vector<256x128xf32> -> vector<256x128xf32>
    %c0_8 = arith.constant 0 : index
    %c0_9 = arith.constant 0 : index
    %12 = vector.load %arg6[%c0_8, %c0_9] : memref<1x128xf32, #tpu.memory_space<vmem>>, vector<1x128xf32>
    %13 = vector.broadcast %12 : vector<1x128xf32> to vector<256x128xf32>
    %14 = arith.addf %11, %13 : vector<256x128xf32>
    %c0_10 = arith.constant 0 : index
    %c0_11 = arith.constant 0 : index
    %15 = vector.load %arg9[%c0_10, %c0_11] : memref<256x128xf32, #tpu.memory_space<vmem>>, vector<256x128xf32>
    tpu.vector_store %arg9[%c0_10, %c0_11], %14 {strides = array<i32>} : memref<256x128xf32, #tpu.memory_space<vmem>>, vector<256x128xf32>,
    %16 = arith.truncf %14 : vector<256x128xf32> to vector<256x128xbf16>
    %c0_12 = arith.constant 0 : index
    %c0_13 = arith.constant 0 : index
    %17 = vector.load %arg7[%c0_12, %c0_13] : memref<128x168xbf16, #tpu.memory_space<vmem>>, vector<128x168xbf16>
    %cst_14 = arith.constant dense<0.000000e+00> : vector<256x168xf32>
    %18 = tpu.matmul %16, %17, %cst_14 {dimension_numbers = #tpu.dot_dimension_numbers<[1], [0], [0], [1], [0, 0, 1, 1], [], []>} : vector<256x128xbf16>, vector<128x168xbf16>, vector<256x168xf32> -> vector<256x168xf32>
    %19 = vector.extract_strided_slice %18 {offsets = [0, 0], sizes = [256, 136], strides = [1, 1]} : vector<256x168xf32> to vector<256x136xf32>
    %c0_15 = arith.constant 0 : index
    %c0_16 = arith.constant 0 : index
    %20 = vector.load %arg10[%c0_15, %c0_16] : memref<256x136xf32, #tpu.memory_space<vmem>>, vector<256x136xf32>
    tpu.vector_store %arg10[%c0_15, %c0_16], %19 {strides = array<i32>} : memref<256x136xf32, #tpu.memory_space<vmem>>, vector<256x136xf32>,
    %21 = vector.extract_strided_slice %18 {offsets = [0, 136], sizes = [256, 32], strides = [1, 1]} : vector<256x168xf32> to vector<256x32xf32>
    %c0_17 = arith.constant 0 : index
    %c0_18 = arith.constant 0 : index
    %22 = vector.load %arg8[%c0_17, %c0_18] : memref<1x32xf32, #tpu.memory_space<vmem>>, vector<1x32xf32>
    %23 = vector.broadcast %22 : vector<1x32xf32> to vector<256x32xf32>
    %24 = arith.addf %21, %23 : vector<256x32xf32>
    %25 = arith.truncf %24 : vector<256x32xf32> to vector<256x32xbf16>
    %c0_19 = arith.constant 0 : index
    %c0_20 = arith.constant 0 : index
    %26 = vector.load %arg11[%c0_19, %c0_20] : memref<256x32xbf16, #tpu.memory_space<vmem>>, vector<256x32xbf16>
    tpu.vector_store %arg11[%c0_19, %c0_20], %25 {strides = array<i32>} : memref<256x32xbf16, #tpu.memory_space<vmem>>, vector<256x32xbf16>,
    %27 = tpu.iota {dimensions = array<i32: 0>} : vector<256x1xi32>
    %c256_i32 = arith.constant 256 : i32
    %28 = arith.muli %arg0, %c256_i32 : i32
    %29 = vector.broadcast %28 : i32 to vector<256x1xi32>
    %30 = arith.addi %27, %29 : vector<256x1xi32>
    %c0_21 = arith.constant 0 : index
    %31 = memref.load %arg1[%c0_21] : memref<1xi32, #tpu.memory_space<smem>>
    %32 = vector.broadcast %31 : i32 to vector<256x1xi32>
    %33 = arith.cmpi slt, %30, %32 : vector<256x1xi32>
    %cst_22 = arith.constant 0.000000e+00 : f32
    %34 = vector.shape_cast %33 : vector<256x1xi1> to vector<256x1xi1>
    %35 = vector.broadcast %34 : vector<256x1xi1> to vector<256x32xi1>
    %36 = vector.broadcast %cst_22 : f32 to vector<256x32xf32>
    %37 = arith.select %35, %24, %36 : vector<256x32xi1>, vector<256x32xf32>
    %cst_23 = arith.constant dense<0.000000e+00> : vector<32xf32>
    %38 = vector.multi_reduction <add>, %37, %cst_23 [0] : vector<256x32xf32> to vector<32xf32>
    %39 = vector.shape_cast %38 : vector<32xf32> to vector<1x32xf32>
    %40 = arith.mulf %37, %37 : vector<256x32xf32>
    %cst_24 = arith.constant dense<0.000000e+00> : vector<32xf32>
    %41 = vector.multi_reduction <add>, %40, %cst_24 [0] : vector<256x32xf32> to vector<32xf32>
    %42 = vector.shape_cast %41 : vector<32xf32> to vector<1x32xf32>
    %43 = tpu.concatenate %39, %42 in 0 : vector<1x32xf32>, vector<1x32xf32> -> vector<2x32xf32>
    %c0_25 = arith.constant 0 : index
    %c0_26 = arith.constant 0 : index
    %c0_27 = arith.constant 0 : index
    %44 = vector.load %arg12[%c0_25, %c0_26, %c0_27] : memref<1x2x32xf32, #tpu.memory_space<vmem>>, vector<1x2x32xf32>
    %45 = vector.shape_cast %44 : vector<1x2x32xf32> to vector<2x32xf32>
    %46 = vector.shape_cast %43 : vector<2x32xf32> to vector<1x2x32xf32>
    tpu.vector_store %arg12[%c0_25, %c0_26, %c0_27], %46 {strides = array<i32>} : memref<1x2x32xf32, #tpu.memory_space<vmem>>, vector<1x2x32xf32>,
    return
  }
  func.func @transform_0(%arg0: i32, %arg1: memref<1xi32, #tpu.memory_space<smem>>) -> (i32, i32) {
    %c0_i32 = arith.constant 0 : i32
    %c0_i32_0 = arith.constant 0 : i32
    return %arg0, %c0_i32 : i32, i32
  }
  func.func @transform_1(%arg0: i32, %arg1: memref<1xi32, #tpu.memory_space<smem>>) -> (i32, i32) {
    %c0_i32 = arith.constant 0 : i32
    %c0_i32_0 = arith.constant 0 : i32
    %c0_i32_1 = arith.constant 0 : i32
    return %c0_i32, %c0_i32_0 : i32, i32
  }
  func.func @transform_2(%arg0: i32, %arg1: memref<1xi32, #tpu.memory_space<smem>>) -> (i32, i32) {
    %c0_i32 = arith.constant 0 : i32
    %c0_i32_0 = arith.constant 0 : i32
    %c0_i32_1 = arith.constant 0 : i32
    return %c0_i32, %c0_i32_0 : i32, i32
  }
  func.func @transform_3(%arg0: i32, %arg1: memref<1xi32, #tpu.memory_space<smem>>) -> (i32, i32) {
    %c0_i32 = arith.constant 0 : i32
    %c0_i32_0 = arith.constant 0 : i32
    %c0_i32_1 = arith.constant 0 : i32
    return %c0_i32, %c0_i32_0 : i32, i32
  }
  func.func @transform_4(%arg0: i32, %arg1: memref<1xi32, #tpu.memory_space<smem>>) -> (i32, i32) {
    %c0_i32 = arith.constant 0 : i32
    %c0_i32_0 = arith.constant 0 : i32
    %c0_i32_1 = arith.constant 0 : i32
    return %c0_i32, %c0_i32_0 : i32, i32
  }
  func.func @transform_5(%arg0: i32, %arg1: memref<1xi32, #tpu.memory_space<smem>>) -> (i32, i32) {
    %c0_i32 = arith.constant 0 : i32
    %c0_i32_0 = arith.constant 0 : i32
    %c0_i32_1 = arith.constant 0 : i32
    return %c0_i32, %c0_i32_0 : i32, i32
  }
  func.func @transform_6(%arg0: i32, %arg1: memref<1xi32, #tpu.memory_space<smem>>) -> (i32, i32) {
    %c0_i32 = arith.constant 0 : i32
    %c0_i32_0 = arith.constant 0 : i32
    %c0_i32_1 = arith.constant 0 : i32
    return %c0_i32, %c0_i32_0 : i32, i32
  }
  func.func @transform_7(%arg0: i32, %arg1: memref<1xi32, #tpu.memory_space<smem>>) -> (i32, i32) {
    %c0_i32 = arith.constant 0 : i32
    %c0_i32_0 = arith.constant 0 : i32
    return %arg0, %c0_i32 : i32, i32
  }
  func.func @transform_8(%arg0: i32, %arg1: memref<1xi32, #tpu.memory_space<smem>>) -> (i32, i32) {
    %c0_i32 = arith.constant 0 : i32
    %c0_i32_0 = arith.constant 0 : i32
    return %arg0, %c0_i32 : i32, i32
  }
  func.func @transform_9(%arg0: i32, %arg1: memref<1xi32, #tpu.memory_space<smem>>) -> (i32, i32) {
    %c0_i32 = arith.constant 0 : i32
    %c0_i32_0 = arith.constant 0 : i32
    return %arg0, %c0_i32 : i32, i32
  }
  func.func @transform_10(%arg0: i32, %arg1: memref<1xi32, #tpu.memory_space<smem>>) -> (i32, i32, i32) {
    %c0_i32 = arith.constant 0 : i32
    %c0_i32_0 = arith.constant 0 : i32
    %c0_i32_1 = arith.constant 0 : i32
    return %arg0, %c0_i32, %c0_i32_0 : i32, i32, i32
  }
}

module attributes {stable_mosaic.version = 11 : i64} {
  func.func @_bn_relu_linear_kernel(%arg0: i32, %arg1: memref<256x32xbf16, #tpu.memory_space<vmem>>, %arg2: memref<1x32xf32, #tpu.memory_space<vmem>>, %arg3: memref<1x32xf32, #tpu.memory_space<vmem>>, %arg4: memref<32x64xbf16, #tpu.memory_space<vmem>>, %arg5: memref<1x64xf32, #tpu.memory_space<vmem>>, %arg6: memref<256x64xf32, #tpu.memory_space<vmem>>) attributes {dimension_semantics = [#tpu.dimension_semantics<parallel>], iteration_bounds = array<i64: 1>, scalar_prefetch = 0 : i64, scratch_operands = 0 : i64, tpu.core_type = #tpu.core_type<tc>, window_params = [{transform_indices = @transform_0, window_bounds = array<i64: 256, 32>}, {pipeline_mode = #tpu.pipeline_mode<synchronous>, transform_indices = @transform_1, window_bounds = array<i64: 1, 32>}, {pipeline_mode = #tpu.pipeline_mode<synchronous>, transform_indices = @transform_2, window_bounds = array<i64: 1, 32>}, {pipeline_mode = #tpu.pipeline_mode<synchronous>, transform_indices = @transform_3, window_bounds = array<i64: 32, 64>}, {pipeline_mode = #tpu.pipeline_mode<synchronous>, transform_indices = @transform_4, window_bounds = array<i64: 1, 64>}, {transform_indices = @transform_5, window_bounds = array<i64: 256, 64>}]} {
    %c0 = arith.constant 0 : index
    %c0_0 = arith.constant 0 : index
    %0 = vector.load %arg1[%c0, %c0_0] : memref<256x32xbf16, #tpu.memory_space<vmem>>, vector<256x32xbf16>
    %1 = arith.extf %0 : vector<256x32xbf16> to vector<256x32xf32>
    %c0_1 = arith.constant 0 : index
    %c0_2 = arith.constant 0 : index
    %2 = vector.load %arg2[%c0_1, %c0_2] : memref<1x32xf32, #tpu.memory_space<vmem>>, vector<1x32xf32>
    %3 = vector.broadcast %2 : vector<1x32xf32> to vector<256x32xf32>
    %4 = arith.mulf %1, %3 : vector<256x32xf32>
    %c0_3 = arith.constant 0 : index
    %c0_4 = arith.constant 0 : index
    %5 = vector.load %arg3[%c0_3, %c0_4] : memref<1x32xf32, #tpu.memory_space<vmem>>, vector<1x32xf32>
    %6 = vector.broadcast %5 : vector<1x32xf32> to vector<256x32xf32>
    %7 = arith.addf %4, %6 : vector<256x32xf32>
    %cst = arith.constant 0.000000e+00 : f32
    %8 = vector.broadcast %cst : f32 to vector<256x32xf32>
    %9 = arith.maximumf %7, %8 : vector<256x32xf32>
    %10 = arith.truncf %9 : vector<256x32xf32> to vector<256x32xbf16>
    %c0_5 = arith.constant 0 : index
    %c0_6 = arith.constant 0 : index
    %11 = vector.load %arg4[%c0_5, %c0_6] : memref<32x64xbf16, #tpu.memory_space<vmem>>, vector<32x64xbf16>
    %cst_7 = arith.constant dense<0.000000e+00> : vector<256x64xf32>
    %12 = tpu.matmul %10, %11, %cst_7 {dimension_numbers = #tpu.dot_dimension_numbers<[1], [0], [0], [1], [0, 0, 1, 1], [], []>} : vector<256x32xbf16>, vector<32x64xbf16>, vector<256x64xf32> -> vector<256x64xf32>
    %c0_8 = arith.constant 0 : index
    %c0_9 = arith.constant 0 : index
    %13 = vector.load %arg5[%c0_8, %c0_9] : memref<1x64xf32, #tpu.memory_space<vmem>>, vector<1x64xf32>
    %14 = vector.broadcast %13 : vector<1x64xf32> to vector<256x64xf32>
    %15 = arith.addf %12, %14 : vector<256x64xf32>
    %c0_10 = arith.constant 0 : index
    %c0_11 = arith.constant 0 : index
    %16 = vector.load %arg6[%c0_10, %c0_11] : memref<256x64xf32, #tpu.memory_space<vmem>>, vector<256x64xf32>
    tpu.vector_store %arg6[%c0_10, %c0_11], %15 {strides = array<i32>} : memref<256x64xf32, #tpu.memory_space<vmem>>, vector<256x64xf32>,
    return
  }
  func.func @transform_0(%arg0: i32) -> (i32, i32) {
    %c0_i32 = arith.constant 0 : i32
    %c0_i32_0 = arith.constant 0 : i32
    return %arg0, %c0_i32 : i32, i32
  }
  func.func @transform_1(%arg0: i32) -> (i32, i32) {
    %c0_i32 = arith.constant 0 : i32
    %c0_i32_0 = arith.constant 0 : i32
    %c0_i32_1 = arith.constant 0 : i32
    return %c0_i32, %c0_i32_0 : i32, i32
  }
  func.func @transform_2(%arg0: i32) -> (i32, i32) {
    %c0_i32 = arith.constant 0 : i32
    %c0_i32_0 = arith.constant 0 : i32
    %c0_i32_1 = arith.constant 0 : i32
    return %c0_i32, %c0_i32_0 : i32, i32
  }
  func.func @transform_3(%arg0: i32) -> (i32, i32) {
    %c0_i32 = arith.constant 0 : i32
    %c0_i32_0 = arith.constant 0 : i32
    %c0_i32_1 = arith.constant 0 : i32
    return %c0_i32, %c0_i32_0 : i32, i32
  }
  func.func @transform_4(%arg0: i32) -> (i32, i32) {
    %c0_i32 = arith.constant 0 : i32
    %c0_i32_0 = arith.constant 0 : i32
    %c0_i32_1 = arith.constant 0 : i32
    return %c0_i32, %c0_i32_0 : i32, i32
  }
  func.func @transform_5(%arg0: i32) -> (i32, i32) {
    %c0_i32 = arith.constant 0 : i32
    %c0_i32_0 = arith.constant 0 : i32
    return %arg0, %c0_i32 : i32, i32
  }
}

</mosaic_0001>

<bundles_post_ra>
// kernel: _forward_padded.3
= control target key start
LH: loop header
LB: loop body
LE: loop exit
PB: predicated region body
PF: predicated region fallthrough
CT: control target
= control target key end

     0   :  { %vm225_vm0 = vcmask 261120   ;;  %vm363_vm1 = vcmask 523264   ;;  %s853_s3 = inlined_call_operand.vmem [shape: bf16[32,64], index: 3, kind: input, shape index: {}]   ;;  %s854_s0 = inlined_call_operand.vmem [shape: bf16[256,32], index: 0, kind: input, shape index: {}]   ;;  %s855_s1 = inlined_call_operand.vmem [shape: f32[1,32], index: 1, kind: input, shape index: {}]   ;;  %s856_s2 = inlined_call_operand.vmem [shape: f32[1,32], index: 2, kind: input, shape index: {}]   ;;  %s857_s4 = inlined_call_operand.vmem [shape: f32[1,64], index: 4, kind: input, shape index: {}]   ;;  %s858_s5 = inlined_call_operand.vmem [shape: f32[256,64], index: 5, kind: output, shape index: {}]  }
   0x1   :  { %v425_v0 = vld [vmem:[%s853_s3 + $0x8] sm:$0xff]  ;;  %v424_v1 = vld [vmem:[%s853_s3] sm:$0xff] }
   0x2   :  { %v427_v2 = vld [vmem:[%s854_s0] sm:$0xff]   ;;  %280 = vmatpush.bf16.msra.mxu0 %v425_v0  ;;  %505 = vmatpush.bf16.msra.mxu1 %v425_v0  ;;  %v490_v14 = vld [vmem:[%s854_s0 + $0x8] sm:$0xff]  }
   0x3   :  { %v428_v3 = vunpack.c.l.bf16 %v427_v2  ;;  %v429_v4 = vunpack.c.h.bf16 %v427_v2  ;;  %v556_v5 = vld [vmem:[%s855_s1] ss:$0 sm:$0xff]  ;;  %506 = vmatpush.bf16.msra.mxu2 %v425_v0  ;;  %507 = vmatpush.bf16.msra.mxu3 %v425_v0  ;;  %v432_v26 = vunpack.c.l.bf16 %v490_v14  ;;  %v494_v35 = vld [vmem:[%s854_s0 + $0x28] sm:$0xff]   ;;  %v433_v39 = vunpack.c.h.bf16 %v490_v14 }
   0x4   :  { %v561_v6 = vld [vmem:[%s856_s2] ss:$0 sm:$0xff]  ;;  %v498_v40 = vld [vmem:[%s854_s0 + $0x48] sm:$0xff]   ;;  %v448_v48 = vunpack.c.l.bf16 %v494_v35  ;;  %v449_v52 = vunpack.c.h.bf16 %v494_v35 }
   0x5   :  { %v493_v7 = vld [vmem:[%s854_s0 + $0x20] sm:$0xff]   ;;  %v89_v9 = vmul.f32 %v556_v5, %v428_v3  ;;  %v90_v10 = vmul.f32 %v556_v5, %v429_v4  ;;  %v91_v46 = vmul.f32 %v556_v5, %v432_v26  ;;  %v92_v47 = vmul.f32 %v556_v5, %v433_v39  ;;  %v502_v49 = vld [vmem:[%s854_s0 + $0x68] sm:$0xff]  }
   0x6   :  { %v497_v8 = vld [vmem:[%s854_s0 + $0x40] sm:$0xff]   ;;  %v444_v11 = vunpack.c.l.bf16 %v493_v7  ;;  %v445_v12 = vunpack.c.h.bf16 %v493_v7  ;;  %281 = vmatpush.bf16.msra.mxu0 %v424_v1  ;;  %508 = vmatpush.bf16.msra.mxu1 %v424_v1  ;;  %v464_v53 = vunpack.c.l.bf16 %v498_v40  ;;  %v99_v54 = vmul.f32 %v556_v5, %v448_v48 }
   0x7   :  { %v501_v13 = vld [vmem:[%s854_s0 + $0x60] sm:$0xff]   ;;  %v460_v15 = vunpack.c.l.bf16 %v497_v8  ;;  %v461_v16 = vunpack.c.h.bf16 %v497_v8  ;;  %v125_v19 = vadd.f32 %v561_v6, %v89_v9  ;;  %v126_v20 = vadd.f32 %v561_v6, %v90_v10  ;;  %509 = vmatpush.bf16.msra.mxu2 %v424_v1  ;;  %510 = vmatpush.bf16.msra.mxu3 %v424_v1 }
   0x8   :  { %v476_v17 = vunpack.c.l.bf16 %v501_v13  ;;  %v477_v18 = vunpack.c.h.bf16 %v501_v13  ;;  %v97_v21 = vmul.f32 %v556_v5, %v444_v11  ;;  %v98_v22 = vmul.f32 %v556_v5, %v445_v12  ;;  %v491_v12 = vld [vmem:[%s854_s0 + $0x10] sm:$0xff]  }
   0x9   :  { %v105_v23 = vmul.f32 %v556_v5, %v460_v15  ;;  %v106_v24 = vmul.f32 %v556_v5, %v461_v16  ;;  %v157_v27 = vmax.f32 %v125_v19, 0.0  ;;  %v158_v28 = vmax.f32 %v126_v20, 0.0 }
   0xa   :  { %v113_v25 = vmul.f32 %v556_v5, %v476_v17  ;;  %v133_v29 = vadd.f32 %v561_v6, %v97_v21  ;;  %v134_v30 = vadd.f32 %v561_v6, %v98_v22  ;;  %v114_v33 = vmul.f32 %v556_v5, %v477_v18  ;;  %v495_v17 = vld [vmem:[%s854_s0 + $0x30] sm:$0xff]  }
   0xb   :  { %v141_v31 = vadd.f32 %v561_v6, %v105_v23  ;;  %v142_v32 = vadd.f32 %v561_v6, %v106_v24  ;;  %v189_v36 = vpack.c.bf16 %v158_v28, %v157_v27  ;;  %v465_v55 = vunpack.c.h.bf16 %v498_v40  ;;  %v499_v21 = vld [vmem:[%s854_s0 + $0x50] sm:$0xff]  }
   0xc   :  { %v149_v34 = vadd.f32 %v561_v6, %v113_v25  ;;  %v165_v37 = vmax.f32 %v133_v29, 0.0  ;;  %v166_v38 = vmax.f32 %v134_v30, 0.0  ;;  %v150_v43 = vadd.f32 %v561_v6, %v114_v33  ;;  %v503_v27 = vld [vmem:[%s854_s0 + $0x70] sm:$0xff]  }
   0xd   :  { %v173_v41 = vmax.f32 %v141_v31, 0.0  ;;  %v174_v42 = vmax.f32 %v142_v32, 0.0  ;;  %408 = vmatmul.msk.bf16.vlgmr.msra.gmra.mxu0 %vm225_vm0, %v189_v36  ;;  %v100_v57 = vmul.f32 %v556_v5, %v449_v52  ;;  %v107_v58 = vmul.f32 %v556_v5, %v464_v53  ;;  %v492_v52 = vld [vmem:[%s854_s0 + $0x18] sm:$0xff]  }
   0xe   :  { %v181_v44 = vmax.f32 %v149_v34, 0.0  ;;  %v193_v45 = vpack.c.bf16 %v166_v38, %v165_v37  ;;  %v182_v51 = vmax.f32 %v150_v43, 0.0  ;;  %v480_v59 = vunpack.c.l.bf16 %v502_v49 }
   0xf   :  { %v197_v50 = vpack.c.bf16 %v174_v42, %v173_v41  ;;  %v127_v60 = vadd.f32 %v561_v6, %v91_v46  ;;  %v128_v61 = vadd.f32 %v561_v6, %v92_v47  ;;  %v108_v62 = vmul.f32 %v556_v5, %v465_v55 }
  0x10   :  { %412 = vmatmul.msk.bf16.vlgmr.msra.gmra.mxu1 %vm225_vm0, %v193_v45  ;;  %v201_v56 = vpack.c.bf16 %v182_v51, %v181_v44  ;;  %v481_v63 = vunpack.c.h.bf16 %v502_v49  ;;  %v115_v0 = vmul.f32 %v556_v5, %v480_v59  ;;  %v135_v1 = vadd.f32 %v561_v6, %v99_v54 }
  0x11   :  { %416 = vmatmul.msk.bf16.vlgmr.msra.gmra.mxu2 %vm225_vm0, %v197_v50  ;;  %v136_v2 = vadd.f32 %v561_v6, %v100_v57  ;;  %v143_v3 = vadd.f32 %v561_v6, %v107_v58  ;;  %v144_v4 = vadd.f32 %v561_v6, %v108_v62  ;;  %v159_v8 = vmax.f32 %v127_v60, 0.0  ;;  %v496_v57 = vld [vmem:[%s854_s0 + $0x38] sm:$0xff]  }
  0x12   :  { %420 = vmatmul.msk.bf16.vlgmr.msra.gmra.mxu3 %vm225_vm0, %v201_v56  ;;  %v116_v7 = vmul.f32 %v556_v5, %v481_v63  ;;  %v160_v9 = vmax.f32 %v128_v61, 0.0  ;;  %v151_v10 = vadd.f32 %v561_v6, %v115_v0  ;;  %v167_v13 = vmax.f32 %v135_v1, 0.0  ;;  %v500_v61 = vld [vmem:[%s854_s0 + $0x58] sm:$0xff]  }
  0x13   :  { %v168_v14 = vmax.f32 %v136_v2, 0.0  ;;  %v175_v15 = vmax.f32 %v143_v3, 0.0  ;;  %v176_v16 = vmax.f32 %v144_v4, 0.0  ;;  %v436_v19 = vunpack.c.l.bf16 %v491_v12  ;;  %v504_v3 = vld [vmem:[%s854_s0 + $0x78] sm:$0xff]  }
  0x14   :  { %v152_v11 = vadd.f32 %v561_v6, %v116_v7  ;;  %v190_v18 = vpack.c.bf16 %v160_v9, %v159_v8  ;;  %v437_v20 = vunpack.c.h.bf16 %v491_v12  ;;  %v183_v22 = vmax.f32 %v151_v10, 0.0 }
  0x15   :  { %v194_v24 = vpack.c.bf16 %v168_v14, %v167_v13  ;;  %v452_v25 = vunpack.c.l.bf16 %v495_v17  ;;  %v453_v26 = vunpack.c.h.bf16 %v495_v17  ;;  %v198_v28 = vpack.c.bf16 %v176_v16, %v175_v15 }
  0x16   :  { %v184_v23 = vmax.f32 %v152_v11, 0.0  ;;  %v468_v29 = vunpack.c.l.bf16 %v499_v21  ;;  %v469_v30 = vunpack.c.h.bf16 %v499_v21  ;;  %v93_v31 = vmul.f32 %v556_v5, %v436_v19 }
  0x17   :  { %v94_v32 = vmul.f32 %v556_v5, %v437_v20  ;;  %v484_v34 = vunpack.c.l.bf16 %v503_v27  ;;  %v485_v35 = vunpack.c.h.bf16 %v503_v27  ;;  %v101_v36 = vmul.f32 %v556_v5, %v452_v25 }
  0x18   :  { %v202_v33 = vpack.c.bf16 %v184_v23, %v183_v22  ;;  %v102_v37 = vmul.f32 %v556_v5, %v453_v26  ;;  %v109_v38 = vmul.f32 %v556_v5, %v468_v29  ;;  %v110_v39 = vmul.f32 %v556_v5, %v469_v30 }
  0x19   :  { %v129_v40 = vadd.f32 %v561_v6, %v93_v31  ;;  %v130_v41 = vadd.f32 %v561_v6, %v94_v32  ;;  %v117_v42 = vmul.f32 %v556_v5, %v484_v34  ;;  %v118_v43 = vmul.f32 %v556_v5, %v485_v35 }
  0x1a   :  { %v137_v44 = vadd.f32 %v561_v6, %v101_v36  ;;  %v138_v45 = vadd.f32 %v561_v6, %v102_v37  ;;  %v145_v46 = vadd.f32 %v561_v6, %v109_v38  ;;  %v146_v47 = vadd.f32 %v561_v6, %v110_v39 }
  0x1b   :  { %v161_v48 = vmax.f32 %v129_v40, 0.0  ;;  %v162_v49 = vmax.f32 %v130_v41, 0.0  ;;  %v153_v50 = vadd.f32 %v561_v6, %v117_v42  ;;  %v154_v51 = vadd.f32 %v561_v6, %v118_v43 }
  0x1c   :  { %v169_v53 = vmax.f32 %v137_v44, 0.0  ;;  %v170_v54 = vmax.f32 %v138_v45, 0.0  ;;  %v177_v55 = vmax.f32 %v145_v46, 0.0  ;;  %v178_v56 = vmax.f32 %v146_v47, 0.0 }
  0x1d   :  { %409 = vmatmul.msk.bf16.gmra.mxu0 %vm225_vm0, %v190_v18  ;;  %v191_v58 = vpack.c.bf16 %v162_v49, %v161_v48  ;;  %v440_v59 = vunpack.c.l.bf16 %v492_v52  ;;  %v441_v60 = vunpack.c.h.bf16 %v492_v52  ;;  %v185_v62 = vmax.f32 %v153_v50, 0.0 }
  0x1e   :  { %v186_v63 = vmax.f32 %v154_v51, 0.0  ;;  %v195_v0 = vpack.c.bf16 %v170_v54, %v169_v53  ;;  %v456_v1 = vunpack.c.l.bf16 %v496_v57  ;;  %v457_v2 = vunpack.c.h.bf16 %v496_v57 }
  0x1f   :  { %v199_v4 = vpack.c.bf16 %v178_v56, %v177_v55  ;;  %v472_v7 = vunpack.c.l.bf16 %v500_v61  ;;  %v473_v8 = vunpack.c.h.bf16 %v500_v61  ;;  %v95_v9 = vmul.f32 %v556_v5, %v440_v59 }
  0x20   :  { %413 = vmatmul.msk.bf16.gmra.mxu1 %vm225_vm0, %v194_v24  ;;  %v96_v10 = vmul.f32 %v556_v5, %v441_v60  ;;  %v203_v11 = vpack.c.bf16 %v186_v63, %v185_v62  ;;  %v488_v12 = vunpack.c.l.bf16 %v504_v3  ;;  %v489_v13 = vunpack.c.h.bf16 %v504_v3 }
  0x21   :  { %417 = vmatmul.msk.bf16.gmra.mxu2 %vm225_vm0, %v198_v28  ;;  %v103_v14 = vmul.f32 %v556_v5, %v456_v1  ;;  %v104_v15 = vmul.f32 %v556_v5, %v457_v2  ;;  %v111_v16 = vmul.f32 %v556_v5, %v472_v7  ;;  %v112_v17 = vmul.f32 %v556_v5, %v473_v8 }
  0x22   :  { %421 = vmatmul.msk.bf16.gmra.mxu3 %vm225_vm0, %v202_v33  ;;  %v131_v18 = vadd.f32 %v561_v6, %v95_v9  ;;  %v132_v19 = vadd.f32 %v561_v6, %v96_v10  ;;  %v119_v20 = vmul.f32 %v556_v5, %v488_v12  ;;  %v120_v21 = vmul.f32 %v556_v5, %v489_v13 }
  0x23   :  { %v139_v22 = vadd.f32 %v561_v6, %v103_v14  ;;  %v140_v23 = vadd.f32 %v561_v6, %v104_v15  ;;  %v147_v24 = vadd.f32 %v561_v6, %v111_v16  ;;  %v148_v25 = vadd.f32 %v561_v6, %v112_v17 }
  0x24   :  { %v163_v26 = vmax.f32 %v131_v18, 0.0  ;;  %v164_v27 = vmax.f32 %v132_v19, 0.0  ;;  %v155_v28 = vadd.f32 %v561_v6, %v119_v20  ;;  %v156_v29 = vadd.f32 %v561_v6, %v120_v21  ;;  %v691_v6 = vld [vmem:[%s857_s4] ss:$0 sm:$0xff] }
  0x25   :  { %v171_v30 = vmax.f32 %v139_v22, 0.0  ;;  %v172_v31 = vmax.f32 %v140_v23, 0.0  ;;  %v179_v32 = vmax.f32 %v147_v24, 0.0  ;;  %v180_v33 = vmax.f32 %v148_v25, 0.0 }
  0x26   :  { %v192_v34 = vpack.c.bf16 %v164_v27, %v163_v26  ;;  %v187_v5 = vmax.f32 %v155_v28, 0.0  ;;  %v188_v35 = vmax.f32 %v156_v29, 0.0 }
  0x27   :  { %v196_v36 = vpack.c.bf16 %v172_v31, %v171_v30  ;;  %v200_v37 = vpack.c.bf16 %v180_v33, %v179_v32 }
  0x28   :  { %v204_v38 = vpack.c.bf16 %v188_v35, %v187_v5 }
  0x2d   :  { %410 = vmatmul.msk.bf16.gmra.mxu0 %vm225_vm0, %v191_v58 }
  0x30   :  { %414 = vmatmul.msk.bf16.gmra.mxu1 %vm225_vm0, %v195_v0 }
  0x31   :  { %418 = vmatmul.msk.bf16.gmra.mxu2 %vm225_vm0, %v199_v4 }
  0x32   :  { %422 = vmatmul.msk.bf16.gmra.mxu3 %vm225_vm0, %v203_v11 }
  0x3d   :  { %411 = vmatmul.msk.bf16.gmra.mxu0 %vm225_vm0, %v192_v34 }
  0x40   :  { %415 = vmatmul.msk.bf16.gmra.mxu1 %vm225_vm0, %v196_v36 }
  0x41   :  { %419 = vmatmul.msk.bf16.gmra.mxu2 %vm225_vm0, %v200_v37 }
  0x42   :  { %423 = vmatmul.msk.bf16.gmra.mxu3 %vm225_vm0, %v204_v38 }
  0x8a   :  { %v283_v39 = vpop.f32.mrf.mxu0 }
  0x8b   :  { %v284_v40 = vadd.f32 %v691_v6, %v283_v39 }
  0x8d   :  { %v303_v41 = vpop.f32.mrf.mxu1  ;;  %364 = vst.msk [vmem:[%s858_s5] sm:$0xff] %vm363_vm1, %v284_v40 }
  0x8e   :  { %v304_v42 = vadd.f32 %v691_v6, %v303_v41 }
  0x90   :  { %372 = vst.msk [vmem:[%s858_s5 + $0x40] sm:$0xff] %vm363_vm1, %v304_v42 }
  0x92   :  { %v285_v43 = vpop.f32.mrf.mxu0 }
  0x93   :  { %v286_v45 = vadd.f32 %v691_v6, %v285_v43 }
  0x94   :  { %v323_v44 = vpop.f32.mrf.mxu2 }
  0x95   :  { %v324_v46 = vadd.f32 %v691_v6, %v323_v44  ;;  %v305_v47 = vpop.f32.mrf.mxu1  ;;  %v343_v48 = vpop.f32.mrf.mxu3  ;;  %365 = vst.msk [vmem:[%s858_s5 + $0x8] sm:$0xff] %vm363_vm1, %v286_v45 }
  0x96   :  { %v306_v49 = vadd.f32 %v691_v6, %v305_v47  ;;  %v344_v50 = vadd.f32 %v691_v6, %v343_v48 }
  0x97   :  { %380 = vst.msk [vmem:[%s858_s5 + $0x80] sm:$0xff] %vm363_vm1, %v324_v46 }
  0x98   :  { %373 = vst.msk [vmem:[%s858_s5 + $0x48] sm:$0xff] %vm363_vm1, %v306_v49 }
  0x99   :  { %388 = vst.msk [vmem:[%s858_s5 + $0xc0] sm:$0xff] %vm363_vm1, %v344_v50 }
  0x9a   :  { %v288_v51 = vpop.f32.mrf.mxu0 }
  0x9b   :  { %v289_v53 = vadd.f32 %v691_v6, %v288_v51 }
  0x9c   :  { %v325_v52 = vpop.f32.mrf.mxu2 }
  0x9d   :  { %v326_v54 = vadd.f32 %v691_v6, %v325_v52  ;;  %v308_v55 = vpop.f32.mrf.mxu1  ;;  %v345_v56 = vpop.f32.mrf.mxu3  ;;  %366 = vst.msk [vmem:[%s858_s5 + $0x10] sm:$0xff] %vm363_vm1, %v289_v53 }
  0x9e   :  { %v309_v57 = vadd.f32 %v691_v6, %v308_v55  ;;  %v346_v58 = vadd.f32 %v691_v6, %v345_v56 }
  0x9f   :  { %381 = vst.msk [vmem:[%s858_s5 + $0x88] sm:$0xff] %vm363_vm1, %v326_v54 }
  0xa0   :  { %374 = vst.msk [vmem:[%s858_s5 + $0x50] sm:$0xff] %vm363_vm1, %v309_v57 }
  0xa1   :  { %389 = vst.msk [vmem:[%s858_s5 + $0xc8] sm:$0xff] %vm363_vm1, %v346_v58 }
  0xa2   :  { %v290_v59 = vpop.f32.mrf.mxu0 }
  0xa3   :  { %v291_v61 = vadd.f32 %v691_v6, %v290_v59 }
  0xa4   :  { %v328_v60 = vpop.f32.mrf.mxu2 }
  0xa5   :  { %v329_v62 = vadd.f32 %v691_v6, %v328_v60  ;;  %v310_v63 = vpop.f32.mrf.mxu1  ;;  %v348_v0 = vpop.f32.mrf.mxu3  ;;  %367 = vst.msk [vmem:[%s858_s5 + $0x18] sm:$0xff] %vm363_vm1, %v291_v61 }
  0xa6   :  { %v311_v1 = vadd.f32 %v691_v6, %v310_v63  ;;  %v349_v2 = vadd.f32 %v691_v6, %v348_v0 }
  0xa7   :  { %382 = vst.msk [vmem:[%s858_s5 + $0x90] sm:$0xff] %vm363_vm1, %v329_v62 }
  0xa8   :  { %375 = vst.msk [vmem:[%s858_s5 + $0x58] sm:$0xff] %vm363_vm1, %v311_v1 }
  0xa9   :  { %390 = vst.msk [vmem:[%s858_s5 + $0xd0] sm:$0xff] %vm363_vm1, %v349_v2 }
  0xaa   :  { %v293_v3 = vpop.f32.mrf.mxu0 }
  0xab   :  { %v294_v7 = vadd.f32 %v691_v6, %v293_v3 }
  0xac   :  { %v330_v4 = vpop.f32.mrf.mxu2 }
  0xad   :  { %v331_v8 = vadd.f32 %v691_v6, %v330_v4  ;;  %v313_v9 = vpop.f32.mrf.mxu1  ;;  %v350_v10 = vpop.f32.mrf.mxu3  ;;  %368 = vst.msk [vmem:[%s858_s5 + $0x20] sm:$0xff] %vm363_vm1, %v294_v7 }
  0xae   :  { %v314_v11 = vadd.f32 %v691_v6, %v313_v9  ;;  %v351_v12 = vadd.f32 %v691_v6, %v350_v10 }
  0xaf   :  { %383 = vst.msk [vmem:[%s858_s5 + $0x98] sm:$0xff] %vm363_vm1, %v331_v8 }
  0xb0   :  { %376 = vst.msk [vmem:[%s858_s5 + $0x60] sm:$0xff] %vm363_vm1, %v314_v11 }
  0xb1   :  { %391 = vst.msk [vmem:[%s858_s5 + $0xd8] sm:$0xff] %vm363_vm1, %v351_v12 }
  0xb2   :  { %v295_v13 = vpop.f32.mrf.mxu0 }
  0xb3   :  { %v296_v15 = vadd.f32 %v691_v6, %v295_v13 }
  0xb4   :  { %v333_v14 = vpop.f32.mrf.mxu2 }
  0xb5   :  { %v334_v16 = vadd.f32 %v691_v6, %v333_v14  ;;  %v315_v17 = vpop.f32.mrf.mxu1  ;;  %v353_v18 = vpop.f32.mrf.mxu3  ;;  %369 = vst.msk [vmem:[%s858_s5 + $0x28] sm:$0xff] %vm363_vm1, %v296_v15 }
  0xb6   :  { %v316_v19 = vadd.f32 %v691_v6, %v315_v17  ;;  %v354_v20 = vadd.f32 %v691_v6, %v353_v18 }
  0xb7   :  { %384 = vst.msk [vmem:[%s858_s5 + $0xa0] sm:$0xff] %vm363_vm1, %v334_v16 }
  0xb8   :  { %377 = vst.msk [vmem:[%s858_s5 + $0x68] sm:$0xff] %vm363_vm1, %v316_v19 }
  0xb9   :  { %392 = vst.msk [vmem:[%s858_s5 + $0xe0] sm:$0xff] %vm363_vm1, %v354_v20 }
  0xba   :  { %v298_v21 = vpop.f32.mrf.mxu0 }
  0xbb   :  { %v299_v23 = vadd.f32 %v691_v6, %v298_v21 }
  0xbc   :  { %v335_v22 = vpop.f32.mrf.mxu2 }
  0xbd   :  { %v336_v24 = vadd.f32 %v691_v6, %v335_v22  ;;  %v318_v25 = vpop.f32.mrf.mxu1  ;;  %v355_v26 = vpop.f32.mrf.mxu3  ;;  %370 = vst.msk [vmem:[%s858_s5 + $0x30] sm:$0xff] %vm363_vm1, %v299_v23 }
  0xbe   :  { %v319_v27 = vadd.f32 %v691_v6, %v318_v25  ;;  %v356_v28 = vadd.f32 %v691_v6, %v355_v26 }
  0xbf   :  { %385 = vst.msk [vmem:[%s858_s5 + $0xa8] sm:$0xff] %vm363_vm1, %v336_v24 }
  0xc0   :  { %378 = vst.msk [vmem:[%s858_s5 + $0x70] sm:$0xff] %vm363_vm1, %v319_v27 }
  0xc1   :  { %393 = vst.msk [vmem:[%s858_s5 + $0xe8] sm:$0xff] %vm363_vm1, %v356_v28 }
  0xc2   :  { %v300_v29 = vpop.f32.mrf.mxu0 }
  0xc3   :  { %v301_v31 = vadd.f32 %v691_v6, %v300_v29 }
  0xc4   :  { %v338_v30 = vpop.f32.mrf.mxu2 }
  0xc5   :  { %v339_v32 = vadd.f32 %v691_v6, %v338_v30  ;;  %v320_v33 = vpop.f32.mrf.mxu1  ;;  %v358_v34 = vpop.f32.mrf.mxu3  ;;  %371 = vst.msk [vmem:[%s858_s5 + $0x38] sm:$0xff] %vm363_vm1, %v301_v31 }
  0xc6   :  { %v321_v5 = vadd.f32 %v691_v6, %v320_v33  ;;  %v359_v35 = vadd.f32 %v691_v6, %v358_v34 }
  0xc7   :  { %386 = vst.msk [vmem:[%s858_s5 + $0xb0] sm:$0xff] %vm363_vm1, %v339_v32 }
  0xc8   :  { %379 = vst.msk [vmem:[%s858_s5 + $0x78] sm:$0xff] %vm363_vm1, %v321_v5 }
  0xc9   :  { %394 = vst.msk [vmem:[%s858_s5 + $0xf0] sm:$0xff] %vm363_vm1, %v359_v35 }
  0xcc   :  { %v340_v36 = vpop.f32.mrf.mxu2 }
  0xcd   :  { %v341_v37 = vadd.f32 %v691_v6, %v340_v36  ;;  %v360_v38 = vpop.f32.mrf.mxu3 }
  0xce   :  { %v361_v39 = vadd.f32 %v691_v6, %v360_v38 }
  0xcf   :  { %387 = vst.msk [vmem:[%s858_s5 + $0xb8] sm:$0xff] %vm363_vm1, %v341_v37 }
  0xd0   :  { %395 = vst.msk [vmem:[%s858_s5 + $0xf8] sm:$0xff] %vm363_vm1, %v361_v39 }

// kernel: _forward_padded.2
= control target key start
LH: loop header
LB: loop body
LE: loop exit
PB: predicated region body
PF: predicated region fallthrough
CT: control target
= control target key end

     0   :  { %v1698_v0 = vmov 0   ;;  %vm336_vm0 = vcmask 261120   ;;  %s1699_s16 = smov 8   ;;  %vm869_vm1 = vcmask 64512   ;;  %s1700_s17 = smov 120   ;;  %vm1361_vm4 = vcmask 326720   ;;  %s2847_s1 = inlined_call_operand.vmem [shape: f32[256,1], index: 1, kind: input, shape index: {}]   ;;  %s2848_s2 = inlined_call_operand.vmem [shape: f32[1,32], index: 2, kind: input, shape index: {}]   ;;  %s2849_s3 = inlined_call_operand.vmem [shape: f32[1,32], index: 3, kind: input, shape index: {}]   ;;  %s2850_s4 = inlined_call_operand.vmem [shape: f32[32,128], index: 4, kind: input, shape index: {}]   ;;  %s2851_s5 = inlined_call_operand.vmem [shape: f32[1,128], index: 5, kind: input, shape index: {}]   ;;  %s2852_s7 = inlined_call_operand.vmem [shape: f32[1,32], index: 7, kind: input, shape index: {}]   ;;  %s2853_s6 = inlined_call_operand.vmem [shape: bf16[128,168], index: 6, kind: input, shape index: {}]   ;;  %s2854_s8 = inlined_call_operand.vmem [shape: f32[256,128], index: 8, kind: output, shape index: {0}]   ;;  %s2855_s9 = inlined_call_operand.vmem [shape: f32[256,136], index: 9, kind: output, shape index: {1}]   ;;  %s2856_s0 = inlined_call_operand.<no memory space> [shape: s32[1], index: 0, kind: input, shape index: {}]   ;;  %s2857_s10 = inlined_call_operand.vmem [shape: bf16[256,32], index: 10, kind: output, shape index: {2}]   ;;  %s2858_s11 = inlined_call_operand.vmem [shape: f32[1,2,32], index: 11, kind: output, shape index: {3}]  }
   0x1   :  { %1693 = vset.pattern.permute.xlu2 %v1698_v0  ;;  %1692 = vset.pattern.permute.xlu1 %v1698_v0  ;;  %v36_v1 = vld [vmem:[%s2847_s1 + $0x20] sm:$0xff]  ;;  %v34_v2 = vld [vmem:[%s2847_s1 + $0x10] sm:$0xff]  ;;  %v37_v4 = vld [vmem:[%s2847_s1 + $0x28] sm:$0xff] }
   0x2   :  { %v32_v3 = vld [vmem:[%s2847_s1] sm:$0xff]  ;;  %1691 = vset.pattern.permute.xlu0 %v1698_v0  ;;  %87 = vperm.xlu2 %1693, %v36_v1   ;;  %v35_v5 = vld [vmem:[%s2847_s1 + $0x18] sm:$0xff]  ;;  %v33_v6 = vld [vmem:[%s2847_s1 + $0x8] sm:$0xff] }
   0x3   :  { %77 = vperm.xlu1 %1692, %v34_v2   ;;  %67 = vperm.xlu0 %1691, %v32_v3   ;;  %v40_v7 = vld [vmem:[%s2847_s1 + $0x40] sm:$0xff]  ;;  %v39_v8 = vld [vmem:[%s2847_s1 + $0x38] sm:$0xff]  ;;  %v38_v9 = vld [vmem:[%s2847_s1 + $0x30] sm:$0xff] }
   0x4   :  { %v43_v10 = vld [vmem:[%s2847_s1 + $0x58] sm:$0xff]  ;;  %v42_v11 = vld [vmem:[%s2847_s1 + $0x50] sm:$0xff]  ;;  %v41_v12 = vld [vmem:[%s2847_s1 + $0x48] sm:$0xff] }
   0x5   :  { %v46_v13 = vld [vmem:[%s2847_s1 + $0x70] sm:$0xff]  ;;  %v45_v14 = vld [vmem:[%s2847_s1 + $0x68] sm:$0xff]  ;;  %v44_v15 = vld [vmem:[%s2847_s1 + $0x60] sm:$0xff] }
   0x6   :  { %v49_v16 = vld [vmem:[%s2847_s1 + $0x88] sm:$0xff]  ;;  %v48_v17 = vld [vmem:[%s2847_s1 + $0x80] sm:$0xff]  ;;  %v47_v18 = vld [vmem:[%s2847_s1 + $0x78] sm:$0xff] }
   0x7   :  { %v52_v19 = vld [vmem:[%s2847_s1 + $0xa0] sm:$0xff]  ;;  %v51_v20 = vld [vmem:[%s2847_s1 + $0x98] sm:$0xff]  ;;  %v50_v21 = vld [vmem:[%s2847_s1 + $0x90] sm:$0xff] }
   0x8   :  { %v55_v22 = vld [vmem:[%s2847_s1 + $0xb8] sm:$0xff]  ;;  %v54_v23 = vld [vmem:[%s2847_s1 + $0xb0] sm:$0xff]  ;;  %v53_v24 = vld [vmem:[%s2847_s1 + $0xa8] sm:$0xff] }
   0x9   :  { %v58_v25 = vld [vmem:[%s2847_s1 + $0xd0] sm:$0xff]  ;;  %v57_v26 = vld [vmem:[%s2847_s1 + $0xc8] sm:$0xff]  ;;  %v56_v27 = vld [vmem:[%s2847_s1 + $0xc0] sm:$0xff] }
   0xa   :  { %92 = vperm.xlu2 %1693, %v37_v4   ;;  %v61_v28 = vld [vmem:[%s2847_s1 + $0xe8] sm:$0xff]  ;;  %v60_v29 = vld [vmem:[%s2847_s1 + $0xe0] sm:$0xff]  ;;  %v59_v30 = vld [vmem:[%s2847_s1 + $0xd8] sm:$0xff] }
   0xb   :  { %82 = vperm.xlu1 %1692, %v35_v5   ;;  %72 = vperm.xlu0 %1691, %v33_v6   ;;  %v63_v31 = vld [vmem:[%s2847_s1 + $0xf8] sm:$0xff]  ;;  %v62_v32 = vld [vmem:[%s2847_s1 + $0xf0] sm:$0xff]  ;;  %v329_v35 = vld [vmem:[%s2850_s4 + $0x8] sm:$0xff] }
   0xc   :  { %v331_v33 = vld [vmem:[%s2850_s4 + $0x18] sm:$0xff]  ;;  %v330_v34 = vld [vmem:[%s2850_s4 + $0x10] sm:$0xff]  ;;  %v328_v36 = vld [vmem:[%s2850_s4] sm:$0xff] }
   0xd   :  { %445 = vmatpush.msra.mxu0 %v331_v33  ;;  %1668 = vmatpush.msra.mxu3 %v331_v33  ;;  %v1872_v40 = vld [vmem:[%s2848_s2] ss:$0 sm:$0xff] }
   0xe   :  { %v1877_v41 = vld [vmem:[%s2849_s3] ss:$0 sm:$0xff] }
   0xf   :  { %446 = vmatpush.msra.mxu0 %v330_v34  ;;  %1669 = vmatpush.msra.mxu3 %v330_v34 }
  0x11   :  { %447 = vmatpush.msra.mxu0 %v329_v35  ;;  %1670 = vmatpush.msra.mxu3 %v329_v35 }
  0x12   :  { %107 = vperm.xlu2 %1693, %v40_v7  }
  0x13   :  { %102 = vperm.xlu1 %1692, %v39_v8   ;;  %97 = vperm.xlu0 %1691, %v38_v9  }
  0x14   :  { %448 = vmatpush.msra.mxu0 %v328_v36  ;;  %1671 = vmatpush.msra.mxu3 %v328_v36 }
  0x1a   :  { %122 = vperm.xlu2 %1693, %v43_v10  }
  0x1b   :  { %117 = vperm.xlu1 %1692, %v42_v11   ;;  %112 = vperm.xlu0 %1691, %v41_v12  }
  0x22   :  { %137 = vperm.xlu2 %1693, %v46_v13  }
  0x23   :  { %132 = vperm.xlu1 %1692, %v45_v14   ;;  %127 = vperm.xlu0 %1691, %v44_v15  }
  0x2a   :  { %152 = vperm.xlu2 %1693, %v49_v16  }
  0x2b   :  { %147 = vperm.xlu1 %1692, %v48_v17   ;;  %142 = vperm.xlu0 %1691, %v47_v18  }
  0x32   :  { %167 = vperm.xlu2 %1693, %v52_v19  }
  0x33   :  { %162 = vperm.xlu1 %1692, %v51_v20   ;;  %157 = vperm.xlu0 %1691, %v50_v21  }
  0x3a   :  { %182 = vperm.xlu2 %1693, %v55_v22  }
  0x3b   :  { %177 = vperm.xlu1 %1692, %v54_v23   ;;  %172 = vperm.xlu0 %1691, %v53_v24  }
  0x42   :  { %197 = vperm.xlu2 %1693, %v58_v25  }
  0x43   :  { %192 = vperm.xlu1 %1692, %v57_v26   ;;  %187 = vperm.xlu0 %1691, %v56_v27  }
  0x4a   :  { %212 = vperm.xlu2 %1693, %v61_v28  }
  0x4b   :  { %207 = vperm.xlu1 %1692, %v60_v29   ;;  %202 = vperm.xlu0 %1691, %v59_v30  }
  0x53   :  { %222 = vperm.xlu1 %1692, %v63_v31   ;;  %217 = vperm.xlu0 %1691, %v62_v32  }
  0x5c   :  { %v88_v37 = vpop.permute.xlu2 %87 }
  0x5d   :  { %v232_v1 = vmul.f32 %v1872_v40, %v88_v37 }
  0x5f   :  { %v268_v3 = vadd.f32 %v1877_v41, %v232_v1 }
  0x61   :  { %v300_v7 = vmax.f32 %v268_v3, 0.0  ;;  %v1630_v3 = vld [vmem:[%s2853_s6 + $0x50] sm:$0xf] }
  0x64   :  { %v93_v38 = vpop.permute.xlu2 %92 }
  0x65   :  { %v233_v8 = vmul.f32 %v1872_v40, %v93_v38 }
  0x67   :  { %v269_v13 = vadd.f32 %v1877_v41, %v233_v8 }
  0x69   :  { %v301_v16 = vmax.f32 %v269_v13, 0.0  ;;  %v1661_v13 = vld [vmem:[%s2853_s6 + $0x44] sm:$0xf0] }
  0x6c   :  { %v108_v39 = vpop.permute.xlu2 %107 }
  0x6d   :  { %v236_v26 = vmul.f32 %v1872_v40, %v108_v39 }
  0x6f   :  { %v272_v30 = vadd.f32 %v1877_v41, %v236_v26 }
  0x71   :  { %v304_v31 = vmax.f32 %v272_v30, 0.0 }
  0x74   :  { %v1879_v42 = vpop.permute.xlu2 %122 }
  0x75   :  { %v78_v43 = vpop.permute.xlu1 %77  ;;  %v68_v44 = vpop.permute.xlu0 %67 }
  0x76   :  { %v228_v45 = vmul.f32 %v1872_v40, %v68_v44  ;;  %v230_v52 = vmul.f32 %v1872_v40, %v78_v43 }
  0x78   :  { %v264_v46 = vadd.f32 %v1877_v41, %v228_v45  ;;  %v266_v55 = vadd.f32 %v1877_v41, %v230_v52  ;;  %v1646_v45 = vld [vmem:[%s2853_s6 + $0x70] sm:$0xf]  ;;  %v1665_v52 = vld [vmem:[%s2853_s6 + $0x64] sm:$0xf0] }
  0x7a   :  { %v296_v47 = vmax.f32 %v264_v46, 0.0  ;;  %v298_v59 = vmax.f32 %v266_v55, 0.0  ;;  %v1667_v46 = vld [vmem:[%s2853_s6 + $0x74] sm:$0xf0] }
  0x7c   :  { %1556 = vmatmul.msk.f32.vlgmr.msra.gmra.mxu0 %vm336_vm0, %v296_v47  ;;  %v1884_v48 = vpop.permute.xlu2 %137  ;;  %v1666_v47 = vld [vmem:[%s2853_s6 + $0x74] sm:$0xf] }
  0x7d   :  { %v83_v49 = vpop.permute.xlu1 %82  ;;  %v73_v50 = vpop.permute.xlu0 %72 }
  0x7e   :  { %v229_v51 = vmul.f32 %v1872_v40, %v73_v50  ;;  %v231_v60 = vmul.f32 %v1872_v40, %v83_v49  ;;  %v1647_v49 = vor.u32 %v1667_v46, %v1646_v45  ;;  %v1648_v50 = vld [vmem:[%s2853_s6 + $0x78] sm:$0xf0]  ;;  %v1656_v45 = vld [vmem:[%s2853_s6 + $0x24] sm:$0xf] }
  0x7f   :  { %v1967_v55 = vor.u32 %v1666_v47, %v1648_v50 }
  0x80   :  { %v265_v53 = vadd.f32 %v1877_v41, %v229_v51  ;;  %v267_v0 = vadd.f32 %v1877_v41, %v231_v60  ;;  %v1638_v51 = vld [vmem:[%s2853_s6 + $0x60] sm:$0xf]  ;;  %690 = vmatpush.bf16.msra.mxu1 %v1647_v49  ;;  %1672 = vmatpush.bf16.msrb.mxu3 %v1647_v49  ;;  %v1608_v49 = vld [vmem:[%s2853_s6 + $0x28] sm:$0xf0] }
  0x81   :  { %v1639_v60 = vor.u32 %v1665_v52, %v1638_v51  ;;  %779 = vmatpush.bf16.msra.mxu2 %v1967_v55 }
  0x82   :  { %v297_v54 = vmax.f32 %v265_v53, 0.0  ;;  %v299_v2 = vmax.f32 %v267_v0, 0.0 }
  0x84   :  { %1557 = vmatmul.msk.f32.gmra.mxu0 %vm336_vm0, %v297_v54  ;;  %v1891_v56 = vpop.permute.xlu2 %152  ;;  %691 = vmatpush.bf16.msra.mxu1 %v1639_v60 }
  0x85   :  { %v103_v57 = vpop.permute.xlu1 %102  ;;  %v98_v58 = vpop.permute.xlu0 %97  ;;  %1673 = vmatpush.bf16.msrb.mxu3 %v1639_v60 }
  0x86   :  { %v234_v17 = vmul.f32 %v1872_v40, %v98_v58  ;;  %v235_v21 = vmul.f32 %v1872_v40, %v103_v57  ;;  %v1664_v57 = vld [vmem:[%s2853_s6 + $0x64] sm:$0xf]  ;;  %v1640_v58 = vld [vmem:[%s2853_s6 + $0x68] sm:$0xf0] }
  0x88   :  { %v270_v20 = vadd.f32 %v1877_v41, %v234_v17  ;;  %v271_v25 = vadd.f32 %v1877_v41, %v235_v21  ;;  %v1660_v17 = vld [vmem:[%s2853_s6 + $0x44] sm:$0xf] }
  0x8a   :  { %v302_v22 = vmax.f32 %v270_v20, 0.0  ;;  %v303_v27 = vmax.f32 %v271_v25, 0.0  ;;  %v1624_v20 = vld [vmem:[%s2853_s6 + $0x48] sm:$0xf0] }
  0x8b   :  { %v2013_v25 = vor.u32 %v1660_v17, %v1624_v20 }
  0x8c   :  { %1558 = vmatmul.msk.f32.gmra.mxu0 %vm336_vm0, %v298_v59  ;;  %v1895_v61 = vpop.permute.xlu2 %167 }
  0x8d   :  { %v118_v62 = vpop.permute.xlu1 %117  ;;  %v113_v63 = vpop.permute.xlu0 %112 }
  0x8e   :  { %v237_v32 = vmul.f32 %v1872_v40, %v113_v63  ;;  %v238_v38 = vmul.f32 %v1872_v40, %v118_v62  ;;  %v1976_v62 = vor.u32 %v1664_v57, %v1640_v58  ;;  %v239_v63 = vmul.f32 %v1872_v40, %v1879_v42  ;;  %v1662_v42 = vld [vmem:[%s2853_s6 + $0x54] sm:$0xf] }
  0x8f   :  { %v1654_v57 = vld [vmem:[%s2853_s6 + $0x14] sm:$0xf] }
  0x90   :  { %v273_v34 = vadd.f32 %v1877_v41, %v237_v32  ;;  %v274_v53 = vadd.f32 %v1877_v41, %v238_v38  ;;  %780 = vmatpush.bf16.msra.mxu2 %v1976_v62  ;;  %v1614_v32 = vld [vmem:[%s2853_s6 + $0x30] sm:$0xf] }
  0x92   :  { %v305_v39 = vmax.f32 %v273_v34, 0.0  ;;  %v306_v0 = vmax.f32 %v274_v53, 0.0  ;;  %v1611_v53 = vor.u32 %v1656_v45, %v1608_v49 }
  0x94   :  { %1559 = vmatmul.msk.f32.gmra.mxu0 %vm336_vm0, %v299_v2  ;;  %v1901_v4 = vpop.permute.xlu2 %182 }
  0x95   :  { %v1903_v5 = vpop.permute.xlu1 %132  ;;  %v1905_v6 = vpop.permute.xlu0 %127 }
  0x96   :  { %v241_v46 = vmul.f32 %v1872_v40, %v1903_v5  ;;  %v1598_v5 = vld [vmem:[%s2853_s6 + $0x10] sm:$0xf] }
  0x98   :  { %v277_v60 = vadd.f32 %v1877_v41, %v241_v46 }
  0x9c   :  { %1560 = vmatmul.msk.f32.gmra.mxu0 %vm336_vm0, %v300_v7  ;;  %v198_v9 = vpop.permute.xlu2 %197  ;;  %v1663_v7 = vld [vmem:[%s2853_s6 + $0x54] sm:$0xf0] }
  0x9d   :  { %v254_v10 = vmul.f32 %v1872_v40, %v198_v9  ;;  %v1910_v11 = vpop.permute.xlu1 %147  ;;  %v1912_v12 = vpop.permute.xlu0 %142  ;;  %v1631_v8 = vor.u32 %v1663_v7, %v1630_v3  ;;  %v1632_v9 = vld [vmem:[%s2853_s6 + $0x58] sm:$0xf0]  ;;  %v1652_v3 = vld [vmem:[%s2853_s6 + $0x4] sm:$0xf] }
  0x9e   :  { %v244_v20 = vmul.f32 %v1872_v40, %v1910_v11 }
  0x9f   :  { %v290_v14 = vadd.f32 %v1877_v41, %v254_v10  ;;  %v1622_v10 = vld [vmem:[%s2853_s6 + $0x40] sm:$0xf]  ;;  %692 = vmatpush.bf16.msra.mxu1 %v1631_v8  ;;  %1674 = vmatpush.bf16.msrb.mxu3 %v1631_v8  ;;  %v242_v8 = vmul.f32 %v1872_v40, %v1884_v48  ;;  %v243_v48 = vmul.f32 %v1872_v40, %v1912_v12 }
  0xa0   :  { %v2098_v12 = vld [vmem:[%s2851_s5] ss:$0 sm:$0xff] }
  0xa1   :  { %v322_v15 = vmax.f32 %v290_v14, 0.0  ;;  %v275_v14 = vadd.f32 %v1877_v41, %v239_v63  ;;  %v279_v17 = vadd.f32 %v1877_v41, %v243_v48 }
  0xa3   :  { %1582 = vmatmul.msk.f32.vlgmr.msra.gmra.mxu3 %vm336_vm0, %v322_v15  ;;  %v307_v26 = vmax.f32 %v275_v14, 0.0  ;;  %v278_v14 = vadd.f32 %v1877_v41, %v242_v8 }
  0xa4   :  { %1561 = vmatmul.msk.f32.gmra.mxu0 %vm336_vm0, %v301_v16  ;;  %v213_v59 = vpop.permute.xlu2 %212  ;;  %v2004_v16 = vor.u32 %v1662_v42, %v1632_v9  ;;  %v1592_v42 = vld [vmem:[%s2853_s6 + $0x8] sm:$0xf0]  ;;  %v309_v9 = vmax.f32 %v277_v60, 0.0 }
  0xa5   :  { %v1919_v18 = vpop.permute.xlu1 %162  ;;  %v1921_v19 = vpop.permute.xlu0 %157  ;;  %v257_v1 = vmul.f32 %v1872_v40, %v213_v59  ;;  %v1600_v59 = vld [vmem:[%s2853_s6 + $0x18] sm:$0xf0] }
  0xa6   :  { %781 = vmatpush.bf16.msra.mxu2 %v2004_v16 }
  0xa7   :  { %v293_v15 = vadd.f32 %v1877_v41, %v257_v1  ;;  %v1590_v1 = vld [vmem:[%s2853_s6] sm:$0xf] }
  0xa9   :  { %v325_v30 = vmax.f32 %v293_v15, 0.0  ;;  %v310_v15 = vmax.f32 %v278_v14, 0.0 }
  0xaa   :  { %782 = vmatpush.bf16.msra.mxu2 %v2013_v25 }
  0xac   :  { %1562 = vmatmul.msk.f32.gmra.mxu0 %vm336_vm0, %v302_v22  ;;  %v1623_v22 = vor.u32 %v1661_v13, %v1622_v10  ;;  %v1595_v13 = vor.u32 %v1652_v3, %v1592_v42 }
  0xad   :  { %v1926_v23 = vpop.permute.xlu1 %177  ;;  %v1928_v24 = vpop.permute.xlu0 %172 }
  0xae   :  { %693 = vmatpush.bf16.msra.mxu1 %v1623_v22  ;;  %1675 = vmatpush.bf16.msrb.mxu3 %v1623_v22 }
  0xb4   :  { %1563 = vmatmul.msk.f32.gmra.mxu0 %vm336_vm0, %v303_v27  ;;  %v240_v27 = vmul.f32 %v1872_v40, %v1905_v6  ;;  %v1658_v6 = vld [vmem:[%s2853_s6 + $0x34] sm:$0xf] }
  0xb5   :  { %v1933_v28 = vpop.permute.xlu1 %192  ;;  %v1935_v29 = vpop.permute.xlu0 %187 }
  0xb6   :  { %v253_v8 = vmul.f32 %v1872_v40, %v1933_v28 }
  0xbc   :  { %1564 = vmatmul.msk.f32.gmra.mxu0 %vm336_vm0, %v304_v31 }
  0xbd   :  { %v203_v33 = vpop.permute.xlu0 %202  ;;  %v208_v36 = vpop.permute.xlu1 %207 }
  0xbe   :  { %v255_v35 = vmul.f32 %v1872_v40, %v203_v33  ;;  %v256_v43 = vmul.f32 %v1872_v40, %v208_v36  ;;  %v1659_v33 = vld [vmem:[%s2853_s6 + $0x34] sm:$0xf0]  ;;  %v276_v36 = vadd.f32 %v1877_v41, %v240_v27 }
  0xbf   :  { %v1615_v34 = vor.u32 %v1659_v33, %v1614_v32 }
  0xc0   :  { %v291_v37 = vadd.f32 %v1877_v41, %v255_v35  ;;  %v292_v54 = vadd.f32 %v1877_v41, %v256_v43  ;;  %v1616_v35 = vld [vmem:[%s2853_s6 + $0x38] sm:$0xf0]  ;;  %v1606_v43 = vld [vmem:[%s2853_s6 + $0x20] sm:$0xf]  ;;  %v308_v50 = vmax.f32 %v276_v36, 0.0 }
  0xc1   :  { %v1619_v38 = vor.u32 %v1658_v6, %v1616_v35  ;;  %694 = vmatpush.bf16.msra.mxu1 %v1615_v34  ;;  %1676 = vmatpush.bf16.msrb.mxu3 %v1615_v34  ;;  %v247_v6 = vmul.f32 %v1872_v40, %v1919_v18  ;;  %v1697_v35 = vld [vmem:[%s2852_s7] ss:$0 sm:$0xff]  ;;  %v248_v18 = vmul.f32 %v1872_v40, %v1895_v61 }
  0xc2   :  { %v323_v44 = vmax.f32 %v291_v37, 0.0  ;;  %v324_v2 = vmax.f32 %v292_v54, 0.0  ;;  %v1655_v54 = vld [vmem:[%s2853_s6 + $0x14] sm:$0xf0]  ;;  %936 = vrot.lane.b32.xlu2 %v1697_v35, %s1699_s16 }
  0xc3   :  { %783 = vmatpush.bf16.msra.mxu2 %v1619_v38  ;;  %v1599_v58 = vor.u32 %v1655_v54, %v1598_v5  ;;  %v283_v36 = vadd.f32 %v1877_v41, %v247_v6 }
  0xc4   :  { %1565 = vmatmul.msk.f32.gmra.mxu0 %vm336_vm0, %v305_v39  ;;  %1583 = vmatmul.msk.f32.gmra.mxu3 %vm336_vm0, %v323_v44  ;;  %v1657_v44 = vld [vmem:[%s2853_s6 + $0x24] sm:$0xf0] }
  0xc5   :  { %v218_v21 = vpop.permute.xlu0 %217  ;;  %v223_v39 = vpop.permute.xlu1 %222  ;;  %v1607_v47 = vor.u32 %v1657_v44, %v1606_v43  ;;  %v284_v44 = vadd.f32 %v1877_v41, %v248_v18 }
  0xc6   :  { %v258_v31 = vmul.f32 %v1872_v40, %v218_v21  ;;  %v259_v51 = vmul.f32 %v1872_v40, %v223_v39 }
  0xc7   :  { %695 = vmatpush.bf16.msra.mxu1 %v1607_v47  ;;  %1677 = vmatpush.bf16.msrb.mxu3 %v1607_v47  ;;  %v316_v46 = vmax.f32 %v284_v44, 0.0  ;;  %v249_v47 = vmul.f32 %v1872_v40, %v1928_v24 }
  0xc8   :  { %v294_v37 = vadd.f32 %v1877_v41, %v258_v31  ;;  %784 = vmatpush.bf16.msra.mxu2 %v1611_v53  ;;  %v295_v63 = vadd.f32 %v1877_v41, %v259_v51  ;;  %v250_v51 = vmul.f32 %v1872_v40, %v1926_v23 }
  0xc9   :  { %v285_v49 = vadd.f32 %v1877_v41, %v249_v47 }
  0xca   :  { %v326_v52 = vmax.f32 %v294_v37, 0.0  ;;  %v327_v10 = vmax.f32 %v295_v63, 0.0  ;;  %v286_v5 = vadd.f32 %v1877_v41, %v250_v51 }
  0xcb   :  { %696 = vmatpush.bf16.msra.mxu1 %v1599_v58  ;;  %1678 = vmatpush.bf16.msrb.mxu3 %v1599_v58  ;;  %v251_v58 = vmul.f32 %v1872_v40, %v1901_v4 }
  0xcc   :  { %1566 = vmatmul.msk.f32.gmra.mxu0 %vm336_vm0, %v306_v0  ;;  %1584 = vmatmul.msk.f32.gmra.mxu3 %vm336_vm0, %v324_v2  ;;  %v1603_v0 = vor.u32 %v1654_v57, %v1600_v59  ;;  %v1653_v2 = vld [vmem:[%s2853_s6 + $0x4] sm:$0xf0]  ;;  %v318_v59 = vmax.f32 %v286_v5, 0.0 }
  0xcd   :  { %v1591_v7 = vor.u32 %v1653_v2, %v1590_v1  ;;  %v287_v63 = vadd.f32 %v1877_v41, %v251_v58  ;;  %v252_v2 = vmul.f32 %v1872_v40, %v1935_v29 }
  0xce   :  { %785 = vmatpush.bf16.msra.mxu2 %v1603_v0 }
  0xcf   :  { %697 = vmatpush.bf16.msra.mxu1 %v1591_v7  ;;  %1679 = vmatpush.bf16.msrb.mxu3 %v1591_v7  ;;  %v319_v1 = vmax.f32 %v287_v63, 0.0  ;;  %v288_v7 = vadd.f32 %v1877_v41, %v252_v2 }
  0xd2   :  { %786 = vmatpush.bf16.msra.mxu2 %v1595_v13 }
  0xd3   :  { %1680 = vmatpush.bf16.msra.mxu3 %v1967_v55  ;;  %v311_v55 = vmax.f32 %v279_v17, 0.0 }
  0xd4   :  { %1567 = vmatmul.msk.f32.gmra.mxu0 %vm336_vm0, %v307_v26  ;;  %1585 = vmatmul.msk.f32.gmra.mxu3 %vm336_vm0, %v325_v30  ;;  %v246_v30 = vmul.f32 %v1872_v40, %v1921_v19 }
  0xd6   :  { %v282_v32 = vadd.f32 %v1877_v41, %v246_v30 }
  0xd7   :  { %1681 = vmatpush.bf16.msra.mxu3 %v1976_v62  ;;  %v280_v62 = vadd.f32 %v1877_v41, %v244_v20 }
  0xd8   :  { %v314_v34 = vmax.f32 %v282_v32, 0.0 }
  0xd9   :  { %v312_v22 = vmax.f32 %v280_v62, 0.0 }
  0xdb   :  { %1682 = vmatpush.bf16.msra.mxu3 %v2004_v16  ;;  %v245_v16 = vmul.f32 %v1872_v40, %v1891_v56 }
  0xdc   :  { %1568 = vmatmul.msk.f32.gmra.mxu0 %vm336_vm0, %v308_v50  ;;  %1586 = vmatmul.msk.f32.gmra.mxu3 %vm336_vm0, %v326_v52  ;;  %v317_v52 = vmax.f32 %v285_v49, 0.0  ;;  %v1164_v49 = vlaneseq }
  0xdd   :  { %v281_v11 = vadd.f32 %v1877_v41, %v245_v16 }
  0xdf   :  { %1683 = vmatpush.bf16.msra.mxu3 %v2013_v25  ;;  %v313_v27 = vmax.f32 %v281_v11, 0.0 }
  0xe3   :  { %1684 = vmatpush.bf16.msra.mxu3 %v1619_v38  ;;  %v315_v38 = vmax.f32 %v283_v36, 0.0 }
  0xe4   :  { %1569 = vmatmul.msk.f32.gmra.mxu0 %vm336_vm0, %v309_v9  ;;  %1587 = vmatmul.msk.f32.gmra.mxu3 %vm336_vm0, %v327_v10  ;;  %v320_v9 = vmax.f32 %v288_v7, 0.0  ;;  %v289_v10 = vadd.f32 %v1877_v41, %v253_v8 }
  0xe6   :  { %v321_v14 = vmax.f32 %v289_v10, 0.0 }
  0xe7   :  { %1685 = vmatpush.bf16.msra.mxu3 %v1611_v53 }
  0xeb   :  { %1686 = vmatpush.bf16.msra.mxu3 %v1603_v0 }
  0xec   :  { %1570 = vmatmul.msk.f32.gmra.mxu0 %vm336_vm0, %v310_v15 }
  0xef   :  { %1687 = vmatpush.bf16.msra.mxu3 %v1595_v13 }
  0xf4   :  { %1571 = vmatmul.msk.f32.gmra.mxu0 %vm336_vm0, %v311_v55 }
  0xf9   :  { %v450_v21 = vpop.f32.mrf.mxu0 }
  0xfa   :  { %v451_v25 = vadd.f32 %v2098_v12, %v450_v21 }
  0xfc   :  { %546 = vst [vmem:[%s2854_s8] sm:$0xff] %v451_v25  ;;  %1572 = vmatmul.msk.f32.gmra.mxu0 %vm336_vm0, %v312_v22 }
 0x101   :  { %v453_v26 = vpop.f32.mrf.mxu0 }
 0x102   :  { %v454_v56 = vadd.f32 %v2098_v12, %v453_v26 }
 0x104   :  { %547 = vst [vmem:[%s2854_s8 + $0x8] sm:$0xff] %v454_v56  ;;  %1573 = vmatmul.msk.f32.gmra.mxu0 %vm336_vm0, %v313_v27  ;;  %v578_v31 = vpack.c.bf16 %v454_v56, %v451_v25 }
 0x106   :  { %698 = vmatmul.bf16.vlgmr.msra.gmra.mxu1 %v578_v31  ;;  %787 = vmatmul.bf16.vlgmr.msra.gmra.mxu2 %v578_v31 }
 0x109   :  { %v456_v33 = vpop.f32.mrf.mxu0 }
 0x10a   :  { %v457_v19 = vadd.f32 %v2098_v12, %v456_v33 }
 0x10c   :  { %548 = vst [vmem:[%s2854_s8 + $0x10] sm:$0xff] %v457_v19  ;;  %1574 = vmatmul.msk.f32.gmra.mxu0 %vm336_vm0, %v314_v34 }
 0x111   :  { %v459_v37 = vpop.f32.mrf.mxu0 }
 0x112   :  { %v460_v39 = vadd.f32 %v2098_v12, %v459_v37 }
 0x114   :  { %549 = vst [vmem:[%s2854_s8 + $0x18] sm:$0xff] %v460_v39  ;;  %1575 = vmatmul.msk.f32.gmra.mxu0 %vm336_vm0, %v315_v38  ;;  %v579_v43 = vpack.c.bf16 %v460_v39, %v457_v19 }
 0x116   :  { %703 = vmatmul.bf16.gmra.mxu1 %v579_v43  ;;  %792 = vmatmul.bf16.gmra.mxu2 %v579_v43 }
 0x119   :  { %v462_v45 = vpop.f32.mrf.mxu0 }
 0x11a   :  { %v463_v61 = vadd.f32 %v2098_v12, %v462_v45 }
 0x11c   :  { %550 = vst [vmem:[%s2854_s8 + $0x20] sm:$0xff] %v463_v61  ;;  %1576 = vmatmul.msk.f32.gmra.mxu0 %vm336_vm0, %v316_v46 }
 0x121   :  { %v465_v50 = vpop.f32.mrf.mxu0 }
 0x122   :  { %v466_v53 = vadd.f32 %v2098_v12, %v465_v50  ;;  %v2245_v50 = vpop.permute.xlu2 %936 }
 0x124   :  { %551 = vst [vmem:[%s2854_s8 + $0x28] sm:$0xff] %v466_v53  ;;  %1577 = vmatmul.msk.f32.gmra.mxu0 %vm336_vm0, %v317_v52  ;;  %v580_v24 = vpack.c.bf16 %v466_v53, %v463_v61  ;;  %v2247_v53 = vshrl.u32 %v1164_v49, 7 }
 0x126   :  { %708 = vmatmul.bf16.gmra.mxu1 %v580_v24  ;;  %797 = vmatmul.bf16.gmra.mxu2 %v580_v24  ;;  %v528_v54 = vpop.f32.mrf.mxu3  ;;  %v1166_v58 = vadd.s32 8, %v2247_v53  ;;  %v1167_v10 = vadd.s32 16, %v2247_v53 }
 0x127   :  { %v529_v57 = vadd.f32 %v2098_v12, %v528_v54  ;;  %v2258_v54 = vstv %s2856_s0 }
 0x128   :  { %vm1233_vm2 = vcmp.lt.s32.totalorder %v2247_v53, %v2258_v54  ;;  %vm1234_vm3 = vcmp.lt.s32.totalorder %v1166_v58, %v2258_v54  ;;  %vm1235_vm5 = vcmp.lt.s32.totalorder %v1167_v10, %v2258_v54 }
 0x129   :  { %572 = vst [vmem:[%s2854_s8 + $0xd0] sm:$0xff] %v529_v57  ;;  %v468_v23 = vpop.f32.mrf.mxu0 }
 0x12a   :  { %v469_v60 = vadd.f32 %v2098_v12, %v468_v23 }
 0x12c   :  { %552 = vst [vmem:[%s2854_s8 + $0x30] sm:$0xff] %v469_v60  ;;  %1578 = vmatmul.msk.f32.gmra.mxu0 %vm336_vm0, %v318_v59 }
 0x131   :  { %v471_v0 = vpop.f32.mrf.mxu0 }
 0x132   :  { %v472_v3 = vadd.f32 %v2098_v12, %v471_v0 }
 0x134   :  { %553 = vst [vmem:[%s2854_s8 + $0x38] sm:$0xff] %v472_v3  ;;  %1579 = vmatmul.msk.f32.gmra.mxu0 %vm336_vm0, %v319_v1  ;;  %v581_v4 = vpack.c.bf16 %v472_v3, %v469_v60 }
 0x136   :  { %713 = vmatmul.bf16.gmra.mxu1 %v581_v4  ;;  %802 = vmatmul.bf16.gmra.mxu2 %v581_v4 }
 0x139   :  { %v474_v42 = vpop.f32.mrf.mxu0 }
 0x13a   :  { %v475_v29 = vadd.f32 %v2098_v12, %v474_v42 }
 0x13c   :  { %554 = vst [vmem:[%s2854_s8 + $0x40] sm:$0xff] %v475_v29  ;;  %1580 = vmatmul.msk.f32.gmra.mxu0 %vm336_vm0, %v320_v9 }
 0x141   :  { %v477_v13 = vpop.f32.mrf.mxu0 }
 0x142   :  { %v478_v15 = vadd.f32 %v2098_v12, %v477_v13 }
 0x144   :  { %555 = vst [vmem:[%s2854_s8 + $0x48] sm:$0xff] %v478_v15  ;;  %1581 = vmatmul.msk.f32.gmra.mxu0 %vm336_vm0, %v321_v14  ;;  %v582_v40 = vpack.c.bf16 %v478_v15, %v475_v29 }
 0x146   :  { %718 = vmatmul.bf16.gmra.mxu1 %v582_v40  ;;  %807 = vmatmul.bf16.gmra.mxu2 %v582_v40 }
 0x147   :  { %v531_v28 = vpop.f32.mrf.mxu3 }
 0x148   :  { %v532_v48 = vadd.f32 %v2098_v12, %v531_v28 }
 0x149   :  { %v480_v17 = vpop.f32.mrf.mxu0 }
 0x14a   :  { %573 = vst [vmem:[%s2854_s8 + $0xd8] sm:$0xff] %v532_v48  ;;  %v481_v41 = vadd.f32 %v2098_v12, %v480_v17  ;;  %v2189_v20 = vpack.c.bf16 %v532_v48, %v529_v57 }
 0x14c   :  { %556 = vst [vmem:[%s2854_s8 + $0x50] sm:$0xff] %v481_v41 }
 0x14f   :  { %v534_v55 = vpop.f32.mrf.mxu3 }
 0x150   :  { %v535_v62 = vadd.f32 %v2098_v12, %v534_v55 }
 0x151   :  { %v483_v21 = vpop.f32.mrf.mxu0 }
 0x152   :  { %574 = vst [vmem:[%s2854_s8 + $0xe0] sm:$0xff] %v535_v62  ;;  %v484_v16 = vadd.f32 %v2098_v12, %v483_v21 }
 0x154   :  { %557 = vst [vmem:[%s2854_s8 + $0x58] sm:$0xff] %v484_v16  ;;  %v583_v22 = vpack.c.bf16 %v484_v16, %v481_v41 }
 0x156   :  { %723 = vmatmul.bf16.gmra.mxu1 %v583_v22  ;;  %812 = vmatmul.bf16.gmra.mxu2 %v583_v22 }
 0x157   :  { %v537_v25 = vpop.f32.mrf.mxu3 }
 0x158   :  { %v538_v11 = vadd.f32 %v2098_v12, %v537_v25  ;;  %v1168_v25 = vadd.s32 24, %v2247_v53 }
 0x159   :  { %v486_v26 = vpop.f32.mrf.mxu0 }
 0x15a   :  { %575 = vst [vmem:[%s2854_s8 + $0xe8] sm:$0xff] %v538_v11  ;;  %v487_v27 = vadd.f32 %v2098_v12, %v486_v26  ;;  %v2207_v30 = vpack.c.bf16 %v538_v11, %v535_v62  ;;  %vm1236_vm6 = vcmp.lt.s32.totalorder %v1168_v25, %v2258_v54 }
 0x15c   :  { %558 = vst [vmem:[%s2854_s8 + $0x60] sm:$0xff] %v487_v27 }
 0x15f   :  { %v540_v56 = vpop.f32.mrf.mxu3 }
 0x160   :  { %v541_v31 = vadd.f32 %v2098_v12, %v540_v56 }
 0x161   :  { %v489_v32 = vpop.f32.mrf.mxu0 }
 0x162   :  { %576 = vst [vmem:[%s2854_s8 + $0xf0] sm:$0xff] %v541_v31  ;;  %v490_v33 = vadd.f32 %v2098_v12, %v489_v32 }
 0x164   :  { %559 = vst [vmem:[%s2854_s8 + $0x68] sm:$0xff] %v490_v33  ;;  %v584_v6 = vpack.c.bf16 %v490_v33, %v487_v27 }
 0x166   :  { %728 = vmatmul.bf16.gmra.mxu1 %v584_v6  ;;  %817 = vmatmul.bf16.gmra.mxu2 %v584_v6 }
 0x167   :  { %v543_v34 = vpop.f32.mrf.mxu3 }
 0x168   :  { %v544_v19 = vadd.f32 %v2098_v12, %v543_v34 }
 0x169   :  { %v492_v35 = vpop.f32.mrf.mxu0 }
 0x16a   :  { %577 = vst [vmem:[%s2854_s8 + $0xf8] sm:$0xff] %v544_v19  ;;  %v493_v36 = vadd.f32 %v2098_v12, %v492_v35  ;;  %v2225_v37 = vpack.c.bf16 %v544_v19, %v541_v31 }
 0x16c   :  { %560 = vst [vmem:[%s2854_s8 + $0x70] sm:$0xff] %v493_v36 }
 0x171   :  { %v495_v18 = vpop.f32.mrf.mxu0 }
 0x172   :  { %v496_v38 = vadd.f32 %v2098_v12, %v495_v18 }
 0x174   :  { %561 = vst [vmem:[%s2854_s8 + $0x78] sm:$0xff] %v496_v38  ;;  %v585_v39 = vpack.c.bf16 %v496_v38, %v493_v36  ;;  %v1169_v38 = vadd.s32 32, %v2247_v53 }
 0x176   :  { %733 = vmatmul.bf16.gmra.mxu1 %v585_v39  ;;  %822 = vmatmul.bf16.gmra.mxu2 %v585_v39  ;;  %vm1237_vm7 = vcmp.lt.s32.totalorder %v1169_v38, %v2258_v54 }
 0x179   :  { %v498_v43 = vpop.f32.mrf.mxu0 }
 0x17a   :  { %v499_v44 = vadd.f32 %v2098_v12, %v498_v43 }
 0x17c   :  { %562 = vst [vmem:[%s2854_s8 + $0x80] sm:$0xff] %v499_v44 }
 0x181   :  { %v501_v45 = vpop.f32.mrf.mxu0 }
 0x182   :  { %v502_v46 = vadd.f32 %v2098_v12, %v501_v45 }
 0x183   :  { %v699_v47 = vpop.f32.mrf.mxu1 }
 0x184   :  { %563 = vst [vmem:[%s2854_s8 + $0x88] sm:$0xff] %v502_v46  ;;  %v586_v61 = vpack.c.bf16 %v502_v46, %v499_v44 }
 0x185   :  { %868 = vst [vmem:[%s2855_s9] sm:$0xff] %v699_v47 }
 0x186   :  { %738 = vmatmul.bf16.gmra.mxu1 %v586_v61  ;;  %827 = vmatmul.bf16.gmra.mxu2 %v586_v61 }
 0x189   :  { %v504_v51 = vpop.f32.mrf.mxu0  ;;  %v788_v52 = vpop.f32.mrf.mxu2 }
 0x18a   :  { %v505_v24 = vadd.f32 %v2098_v12, %v504_v51  ;;  %870 = vst.msk [vmem:[%s2855_s9 + $0x8] sm:$0xff] %vm869_vm1, %v788_v52  ;;  %v939_v5 = vadd.f32 %v2245_v50, %v788_v52 }
 0x18b   :  { %v701_v57 = vpop.f32.mrf.mxu1 }
 0x18c   :  { %564 = vst [vmem:[%s2854_s8 + $0x90] sm:$0xff] %v505_v24  ;;  %v971_v23 = vpack.c.bf16 %v939_v5, %v939_v5  ;;  %v1329_v59 = vsel %vm1233_vm2, %v939_v5, 0.0  ;;  %vm1131_vm2 = vcmask 257024  }
 0x18d   :  { %871 = vst [vmem:[%s2855_s9 + $0x10] sm:$0xff] %v701_v57  ;;  %v1431_v2 = vmul.f32 %v1329_v59, %v1329_v59  ;;  %v1362_v8 = vsel %vm1361_vm4, %v1329_v59, 0.0  ;;  %v1170_v57 = vadd.s32 40, %v2247_v53 }
 0x18e   :  { %1035 = vrot.lane.b32.xlu0 %v971_v23, %s1700_s17 }
 0x18f   :  { %v1463_v14 = vsel %vm1361_vm4, %v1431_v2, 0.0  ;;  %vm1238_vm8 = vcmp.lt.s32.totalorder %v1170_v57, %v2258_v54 }
 0x191   :  { %v507_v60 = vpop.f32.mrf.mxu0  ;;  %v790_v63 = vpop.f32.mrf.mxu2 }
 0x192   :  { %v508_v0 = vadd.f32 %v2098_v12, %v507_v60  ;;  %872 = vst.msk [vmem:[%s2855_s9 + $0x18] sm:$0xff] %vm869_vm1, %v790_v63  ;;  %v940_v1 = vadd.f32 %v2245_v50, %v790_v63 }
 0x193   :  { %v704_v3 = vpop.f32.mrf.mxu1 }
 0x194   :  { %565 = vst [vmem:[%s2854_s8 + $0x98] sm:$0xff] %v508_v0  ;;  %v972_v4 = vpack.c.bf16 %v940_v1, %v940_v1  ;;  %v1330_v7 = vsel %vm1234_vm3, %v940_v1, 0.0  ;;  %v587_v42 = vpack.c.bf16 %v508_v0, %v505_v24 }
 0x195   :  { %v1363_v9 = vsel %vm1361_vm4, %v1330_v7, 0.0  ;;  %v1432_v29 = vmul.f32 %v1330_v7, %v1330_v7  ;;  %873 = vst [vmem:[%s2855_s9 + $0x20] sm:$0xff] %v704_v3 }
 0x196   :  { %v1364_v13 = vadd.f32 %v1363_v9, %v1362_v8  ;;  %1037 = vrot.lane.b32.xlu1 %v972_v4, %s1700_s17  ;;  %743 = vmatmul.bf16.gmra.mxu1 %v587_v42  ;;  %v1171_v9 = vadd.s32 48, %v2247_v53 }
 0x197   :  { %v1464_v15 = vsel %vm1361_vm4, %v1432_v29, 0.0  ;;  %832 = vmatmul.bf16.gmra.mxu2 %v587_v42 }
 0x198   :  { %v1465_v40 = vadd.f32 %v1464_v15, %v1463_v14  ;;  %vm1239_vm9 = vcmp.lt.s32.totalorder %v1171_v9, %v2258_v54 }
 0x199   :  { %v510_v28 = vpop.f32.mrf.mxu0  ;;  %v793_v48 = vpop.f32.mrf.mxu2 }
 0x19a   :  { %v511_v17 = vadd.f32 %v2098_v12, %v510_v28  ;;  %874 = vst.msk [vmem:[%s2855_s9 + $0x28] sm:$0xff] %vm869_vm1, %v793_v48  ;;  %v941_v41 = vadd.f32 %v2245_v50, %v793_v48 }
 0x19b   :  { %v706_v55 = vpop.f32.mrf.mxu1 }
 0x19c   :  { %566 = vst [vmem:[%s2854_s8 + $0xa0] sm:$0xff] %v511_v17  ;;  %v973_v62 = vpack.c.bf16 %v941_v41, %v941_v41  ;;  %v1331_v21 = vsel %vm1235_vm5, %v941_v41, 0.0 }
 0x19d   :  { %v1365_v16 = vsel %vm1361_vm4, %v1331_v21, 0.0  ;;  %v1433_v22 = vmul.f32 %v1331_v21, %v1331_v21  ;;  %875 = vst [vmem:[%s2855_s9 + $0x30] sm:$0xff] %v706_v55  ;;  %v1172_v21 = vadd.s32 56, %v2247_v53 }
 0x19e   :  { %v1366_v11 = vadd.f32 %v1365_v16, %v1364_v13  ;;  %1039 = vrot.lane.b32.xlu2 %v973_v62, %s1700_s17 }
 0x19f   :  { %v1466_v26 = vsel %vm1361_vm4, %v1433_v22, 0.0  ;;  %vm1240_vm10 = vcmp.lt.s32.totalorder %v1172_v21, %v2258_v54  ;;  %v1177_v21 = vadd.s32 96, %v2247_v53 }
 0x1a0   :  { %v1467_v27 = vadd.f32 %v1466_v26, %v1465_v40 }
 0x1a1   :  { %v513_v56 = vpop.f32.mrf.mxu0  ;;  %v795_v31 = vpop.f32.mrf.mxu2  ;;  %vm1245_vm15 = vcmp.lt.s32.totalorder %v1177_v21, %v2258_v54  ;;  %v1182_v21 = vadd.s32 136, %v2247_v53 }
 0x1a2   :  { %v514_v32 = vadd.f32 %v2098_v12, %v513_v56  ;;  %876 = vst.msk [vmem:[%s2855_s9 + $0x38] sm:$0xff] %vm869_vm1, %v795_v31  ;;  %v942_v33 = vadd.f32 %v2245_v50, %v795_v31 }
 0x1a3   :  { %v709_v6 = vpop.f32.mrf.mxu1 }
 0x1a4   :  { %567 = vst [vmem:[%s2854_s8 + $0xa8] sm:$0xff] %v514_v32  ;;  %v974_v34 = vpack.c.bf16 %v942_v33, %v942_v33  ;;  %v1332_v19 = vsel %vm1236_vm6, %v942_v33, 0.0  ;;  %v588_v35 = vpack.c.bf16 %v514_v32, %v511_v17 }
 0x1a5   :  { %v1367_v36 = vsel %vm1361_vm4, %v1332_v19, 0.0  ;;  %v1434_v18 = vmul.f32 %v1332_v19, %v1332_v19  ;;  %877 = vst [vmem:[%s2855_s9 + $0x40] sm:$0xff] %v709_v6 }
 0x1a6   :  { %v1368_v39 = vadd.f32 %v1367_v36, %v1366_v11  ;;  %1041 = vrot.lane.b32.xlu0 %v974_v34, %s1700_s17  ;;  %748 = vmatmul.bf16.gmra.mxu1 %v588_v35 }
 0x1a7   :  { %v1468_v43 = vsel %vm1361_vm4, %v1434_v18, 0.0  ;;  %837 = vmatmul.bf16.gmra.mxu2 %v588_v35 }
 0x1a8   :  { %v1469_v44 = vadd.f32 %v1468_v43, %v1467_v27 }
 0x1a9   :  { %v516_v45 = vpop.f32.mrf.mxu0  ;;  %v798_v46 = vpop.f32.mrf.mxu2 }
 0x1aa   :  { %v517_v47 = vadd.f32 %v2098_v12, %v516_v45  ;;  %878 = vst.msk [vmem:[%s2855_s9 + $0x48] sm:$0xff] %vm869_vm1, %v798_v46  ;;  %v943_v61 = vadd.f32 %v2245_v50, %v798_v46 }
 0x1ab   :  { %v711_v49 = vpop.f32.mrf.mxu1 }
 0x1ac   :  { %568 = vst [vmem:[%s2854_s8 + $0xb0] sm:$0xff] %v517_v47  ;;  %v975_v51 = vpack.c.bf16 %v943_v61, %v943_v61  ;;  %v1333_v52 = vsel %vm1237_vm7, %v943_v61, 0.0  ;;  %v1174_v61 = vadd.s32 72, %v2247_v53  ;;  %vm1250_vm7 = vcmp.lt.s32.totalorder %v1182_v21, %v2258_v54 }
 0x1ad   :  { %v1369_v24 = vsel %vm1361_vm4, %v1333_v52, 0.0  ;;  %v1435_v5 = vmul.f32 %v1333_v52, %v1333_v52  ;;  %879 = vst [vmem:[%s2855_s9 + $0x50] sm:$0xff] %v711_v49  ;;  %v1187_v21 = vadd.s32 176, %v2247_v53 }
 0x1ae   :  { %v1370_v23 = vadd.f32 %v1369_v24, %v1368_v39  ;;  %1043 = vrot.lane.b32.xlu1 %v975_v51, %s1700_s17  ;;  %vm1242_vm12 = vcmp.lt.s32.totalorder %v1174_v61, %v2258_v54 }
 0x1af   :  { %v1470_v58 = vsel %vm1361_vm4, %v1435_v5, 0.0 }
 0x1b0   :  { %v1471_v59 = vadd.f32 %v1470_v58, %v1469_v44 }
 0x1b1   :  { %v519_v60 = vpop.f32.mrf.mxu0  ;;  %v800_v63 = vpop.f32.mrf.mxu2 }
 0x1b2   :  { %v520_v0 = vadd.f32 %v2098_v12, %v519_v60  ;;  %880 = vst.msk [vmem:[%s2855_s9 + $0x58] sm:$0xff] %vm869_vm1, %v800_v63  ;;  %v944_v1 = vadd.f32 %v2245_v50, %v800_v63  ;;  %v1175_v63 = vadd.s32 80, %v2247_v53 }
 0x1b3   :  { %v714_v2 = vpop.f32.mrf.mxu1 }
 0x1b4   :  { %569 = vst [vmem:[%s2854_s8 + $0xb8] sm:$0xff] %v520_v0  ;;  %v976_v3 = vpack.c.bf16 %v944_v1, %v944_v1  ;;  %v1334_v4 = vsel %vm1238_vm8, %v944_v1, 0.0  ;;  %v589_v7 = vpack.c.bf16 %v520_v0, %v517_v47  ;;  %vm1243_vm13 = vcmp.lt.s32.totalorder %v1175_v63, %v2258_v54 }
 0x1b5   :  { %v1371_v42 = vsel %vm1361_vm4, %v1334_v4, 0.0  ;;  %v1436_v8 = vmul.f32 %v1334_v4, %v1334_v4  ;;  %881 = vst [vmem:[%s2855_s9 + $0x60] sm:$0xff] %v714_v2 }
 0x1b6   :  { %v1372_v29 = vadd.f32 %v1371_v42, %v1370_v23  ;;  %1045 = vrot.lane.b32.xlu2 %v976_v3, %s1700_s17  ;;  %753 = vmatmul.bf16.gmra.mxu1 %v589_v7 }
 0x1b7   :  { %v1472_v10 = vsel %vm1361_vm4, %v1436_v8, 0.0  ;;  %842 = vmatmul.bf16.gmra.mxu2 %v589_v7 }
 0x1b8   :  { %v1473_v13 = vadd.f32 %v1472_v10, %v1471_v59  ;;  %v1176_v10 = vadd.s32 88, %v2247_v53 }
 0x1b9   :  { %v522_v14 = vpop.f32.mrf.mxu0  ;;  %v803_v15 = vpop.f32.mrf.mxu2 }
 0x1ba   :  { %v523_v40 = vadd.f32 %v2098_v12, %v522_v14  ;;  %882 = vst.msk [vmem:[%s2855_s9 + $0x68] sm:$0xff] %vm869_vm1, %v803_v15  ;;  %v945_v28 = vadd.f32 %v2245_v50, %v803_v15  ;;  %vm1244_vm14 = vcmp.lt.s32.totalorder %v1176_v10, %v2258_v54  ;;  %v1181_v10 = vadd.s32 128, %v2247_v53 }
 0x1bb   :  { %v716_v48 = vpop.f32.mrf.mxu1 }
 0x1bc   :  { %570 = vst [vmem:[%s2854_s8 + $0xc0] sm:$0xff] %v523_v40  ;;  %v977_v17 = vpack.c.bf16 %v945_v28, %v945_v28  ;;  %v1335_v41 = vsel %vm1239_vm9, %v945_v28, 0.0  ;;  %vm1249_vm6 = vcmp.lt.s32.totalorder %v1181_v10, %v2258_v54  ;;  %v1186_v10 = vadd.s32 168, %v2247_v53 }
 0x1bd   :  { %v1373_v55 = vsel %vm1361_vm4, %v1335_v41, 0.0  ;;  %v1437_v62 = vmul.f32 %v1335_v41, %v1335_v41  ;;  %883 = vst [vmem:[%s2855_s9 + $0x70] sm:$0xff] %v716_v48 }
 0x1be   :  { %v1374_v16 = vadd.f32 %v1373_v55, %v1372_v29  ;;  %1047 = vrot.lane.b32.xlu0 %v977_v17, %s1700_s17 }
 0x1bf   :  { %v1474_v22 = vsel %vm1361_vm4, %v1437_v62, 0.0 }
 0x1c0   :  { %v1475_v25 = vadd.f32 %v1474_v22, %v1473_v13 }
 0x1c1   :  { %v525_v11 = vpop.f32.mrf.mxu0  ;;  %v805_v26 = vpop.f32.mrf.mxu2 }
 0x1c2   :  { %v526_v27 = vadd.f32 %v2098_v12, %v525_v11  ;;  %884 = vst.msk [vmem:[%s2855_s9 + $0x78] sm:$0xff] %vm869_vm1, %v805_v26  ;;  %v946_v56 = vadd.f32 %v2245_v50, %v805_v26  ;;  %v1173_v12 = vadd.s32 64, %v2247_v53 }
 0x1c3   :  { %v719_v31 = vpop.f32.mrf.mxu1 }
 0x1c4   :  { %571 = vst [vmem:[%s2854_s8 + $0xc8] sm:$0xff] %v526_v27  ;;  %v2384_v32 = vpack.c.bf16 %v526_v27, %v523_v40  ;;  %v978_v33 = vpack.c.bf16 %v946_v56, %v946_v56  ;;  %v1336_v6 = vsel %vm1240_vm10, %v946_v56, 0.0  ;;  %vm1241_vm11 = vcmp.lt.s32.totalorder %v1173_v12, %v2258_v54 }
 0x1c5   :  { %v1375_v34 = vsel %vm1361_vm4, %v1336_v6, 0.0  ;;  %v1438_v19 = vmul.f32 %v1336_v6, %v1336_v6  ;;  %885 = vst [vmem:[%s2855_s9 + $0x80] sm:$0xff] %v719_v31 }
 0x1c6   :  { %v1376_v35 = vadd.f32 %v1375_v34, %v1374_v16  ;;  %1049 = vrot.lane.b32.xlu1 %v978_v33, %s1700_s17  ;;  %758 = vmatmul.bf16.vlgmr.msrb.gmra.mxu3 %v2384_v32  ;;  %v1178_v34 = vadd.s32 104, %v2247_v53 }
 0x1c7   :  { %v1476_v36 = vsel %vm1361_vm4, %v1438_v19, 0.0 }
 0x1c8   :  { %v1477_v18 = vadd.f32 %v1476_v36, %v1475_v25  ;;  %vm1246_vm0 = vcmp.lt.s32.totalorder %v1178_v34, %v2258_v54 }
 0x1c9   :  { %v808_v38 = vpop.f32.mrf.mxu2 }
 0x1ca   :  { %886 = vst.msk [vmem:[%s2855_s9 + $0x88] sm:$0xff] %vm869_vm1, %v808_v38  ;;  %v947_v39 = vadd.f32 %v2245_v50, %v808_v38 }
 0x1cb   :  { %v721_v43 = vpop.f32.mrf.mxu1 }
 0x1cc   :  { %v979_v44 = vpack.c.bf16 %v947_v39, %v947_v39  ;;  %v1337_v45 = vsel %vm1241_vm11, %v947_v39, 0.0  ;;  %887 = vst [vmem:[%s2855_s9 + $0x90] sm:$0xff] %v721_v43  ;;  %vm1254_vm11 = vcmp.lt.s32.totalorder %v1186_v10, %v2258_v54 }
 0x1cd   :  { %v1377_v46 = vsel %vm1361_vm4, %v1337_v45, 0.0  ;;  %v1439_v47 = vmul.f32 %v1337_v45, %v1337_v45 }
 0x1ce   :  { %v1378_v49 = vadd.f32 %v1377_v46, %v1376_v35  ;;  %1051 = vrot.lane.b32.xlu2 %v979_v44, %s1700_s17  ;;  %v1179_v46 = vadd.s32 112, %v2247_v53 }
 0x1cf   :  { %v1478_v51 = vsel %vm1361_vm4, %v1439_v47, 0.0 }
 0x1d0   :  { %v1479_v52 = vadd.f32 %v1478_v51, %v1477_v18  ;;  %vm1247_vm3 = vcmp.lt.s32.totalorder %v1179_v46, %v2258_v54 }
 0x1d1   :  { %v810_v24 = vpop.f32.mrf.mxu2 }
 0x1d2   :  { %888 = vst.msk [vmem:[%s2855_s9 + $0x98] sm:$0xff] %vm869_vm1, %v810_v24  ;;  %v948_v5 = vadd.f32 %v2245_v50, %v810_v24 }
 0x1d3   :  { %v724_v57 = vpop.f32.mrf.mxu1 }
 0x1d4   :  { %v980_v23 = vpack.c.bf16 %v948_v5, %v948_v5  ;;  %v1338_v58 = vsel %vm1242_vm12, %v948_v5, 0.0  ;;  %889 = vst [vmem:[%s2855_s9 + $0xa0] sm:$0xff] %v724_v57  ;;  %vm1255_vm12 = vcmp.lt.s32.totalorder %v1187_v21, %v2258_v54 }
 0x1d5   :  { %v1379_v59 = vsel %vm1361_vm4, %v1338_v58, 0.0  ;;  %v1440_v60 = vmul.f32 %v1338_v58, %v1338_v58 }
 0x1d6   :  { %v1380_v0 = vadd.f32 %v1379_v59, %v1378_v49  ;;  %1053 = vrot.lane.b32.xlu0 %v980_v23, %s1700_s17  ;;  %763 = vmatmul.bf16.gmra.mxu3 %v2189_v20 }
 0x1d7   :  { %v1480_v1 = vsel %vm1361_vm4, %v1440_v60, 0.0  ;;  %v1180_v60 = vadd.s32 120, %v2247_v53 }
 0x1d8   :  { %v1481_v2 = vadd.f32 %v1480_v1, %v1479_v52 }
 0x1d9   :  { %v813_v3 = vpop.f32.mrf.mxu2  ;;  %vm1248_vm5 = vcmp.lt.s32.totalorder %v1180_v60, %v2258_v54 }
 0x1da   :  { %890 = vst.msk [vmem:[%s2855_s9 + $0xa8] sm:$0xff] %vm869_vm1, %v813_v3  ;;  %v949_v4 = vadd.f32 %v2245_v50, %v813_v3 }
 0x1db   :  { %v726_v7 = vpop.f32.mrf.mxu1 }
 0x1dc   :  { %v981_v42 = vpack.c.bf16 %v949_v4, %v949_v4  ;;  %v1339_v8 = vsel %vm1243_vm13, %v949_v4, 0.0  ;;  %891 = vst [vmem:[%s2855_s9 + $0xb0] sm:$0xff] %v726_v7 }
 0x1dd   :  { %v1381_v9 = vsel %vm1361_vm4, %v1339_v8, 0.0  ;;  %v1441_v29 = vmul.f32 %v1339_v8, %v1339_v8 }
 0x1de   :  { %v1382_v13 = vadd.f32 %v1381_v9, %v1380_v0  ;;  %1055 = vrot.lane.b32.xlu1 %v981_v42, %s1700_s17 }
 0x1df   :  { %v1482_v14 = vsel %vm1361_vm4, %v1441_v29, 0.0 }
 0x1e0   :  { %v1483_v15 = vadd.f32 %v1482_v14, %v1481_v2 }
 0x1e1   :  { %v815_v40 = vpop.f32.mrf.mxu2 }
 0x1e2   :  { %892 = vst.msk [vmem:[%s2855_s9 + $0xb8] sm:$0xff] %vm869_vm1, %v815_v40  ;;  %v950_v28 = vadd.f32 %v2245_v50, %v815_v40 }
 0x1e3   :  { %v729_v48 = vpop.f32.mrf.mxu1 }
 0x1e4   :  { %v982_v17 = vpack.c.bf16 %v950_v28, %v950_v28  ;;  %v1340_v41 = vsel %vm1244_vm14, %v950_v28, 0.0  ;;  %893 = vst [vmem:[%s2855_s9 + $0xc0] sm:$0xff] %v729_v48 }
 0x1e5   :  { %v1383_v55 = vsel %vm1361_vm4, %v1340_v41, 0.0  ;;  %v1442_v62 = vmul.f32 %v1340_v41, %v1340_v41 }
 0x1e6   :  { %v1384_v16 = vadd.f32 %v1383_v55, %v1382_v13  ;;  %1057 = vrot.lane.b32.xlu2 %v982_v17, %s1700_s17  ;;  %768 = vmatmul.bf16.gmra.mxu3 %v2207_v30 }
 0x1e7   :  { %v1484_v22 = vsel %vm1361_vm4, %v1442_v62, 0.0 }
 0x1e8   :  { %v1485_v25 = vadd.f32 %v1484_v22, %v1483_v15 }
 0x1e9   :  { %v818_v11 = vpop.f32.mrf.mxu2 }
 0x1ea   :  { %894 = vst.msk [vmem:[%s2855_s9 + $0xc8] sm:$0xff] %vm869_vm1, %v818_v11  ;;  %v951_v26 = vadd.f32 %v2245_v50, %v818_v11 }
 0x1eb   :  { %v731_v27 = vpop.f32.mrf.mxu1 }
 0x1ec   :  { %v983_v56 = vpack.c.bf16 %v951_v26, %v951_v26  ;;  %v1341_v31 = vsel %vm1245_vm15, %v951_v26, 0.0  ;;  %895 = vst [vmem:[%s2855_s9 + $0xd0] sm:$0xff] %v731_v27 }
 0x1ed   :  { %v1385_v33 = vsel %vm1361_vm4, %v1341_v31, 0.0  ;;  %v1443_v6 = vmul.f32 %v1341_v31, %v1341_v31 }
 0x1ee   :  { %v1386_v19 = vadd.f32 %v1385_v33, %v1384_v16  ;;  %1059 = vrot.lane.b32.xlu0 %v983_v56, %s1700_s17 }
 0x1ef   :  { %v1486_v12 = vsel %vm1361_vm4, %v1443_v6, 0.0 }
 0x1f0   :  { %v1487_v35 = vadd.f32 %v1486_v12, %v1485_v25  ;;  %v1183_v12 = vadd.s32 144, %v2247_v53 }
 0x1f1   :  { %v820_v36 = vpop.f32.mrf.mxu2 }
 0x1f2   :  { %896 = vst.msk [vmem:[%s2855_s9 + $0xd8] sm:$0xff] %vm869_vm1, %v820_v36  ;;  %v952_v18 = vadd.f32 %v2245_v50, %v820_v36  ;;  %vm1251_vm8 = vcmp.lt.s32.totalorder %v1183_v12, %v2258_v54 }
 0x1f3   :  { %v734_v38 = vpop.f32.mrf.mxu1 }
 0x1f4   :  { %v984_v39 = vpack.c.bf16 %v952_v18, %v952_v18  ;;  %v1342_v43 = vsel %vm1246_vm0, %v952_v18, 0.0  ;;  %897 = vst [vmem:[%s2855_s9 + $0xe0] sm:$0xff] %v734_v38 }
 0x1f5   :  { %v1387_v44 = vsel %vm1361_vm4, %v1342_v43, 0.0  ;;  %v1444_v45 = vmul.f32 %v1342_v43, %v1342_v43 }
 0x1f6   :  { %v1388_v47 = vadd.f32 %v1387_v44, %v1386_v19  ;;  %1061 = vrot.lane.b32.xlu1 %v984_v39, %s1700_s17  ;;  %773 = vmatmul.bf16.gmra.mxu3 %v2225_v37 }
 0x1f7   :  { %v1488_v61 = vsel %vm1361_vm4, %v1444_v45, 0.0 }
 0x1f8   :  { %v1489_v49 = vadd.f32 %v1488_v61, %v1487_v35  ;;  %v1040_v51 = vpop.permute.xlu2 %1039 }
 0x1f9   :  { %1134 = vst.msk [vmem:[%s2857_s10 + $0x8] sm:$0xf] %vm1131_vm2, %v1040_v51  ;;  %v823_v52 = vpop.f32.mrf.mxu2 }
 0x1fa   :  { %898 = vst.msk [vmem:[%s2855_s9 + $0xe8] sm:$0xff] %vm869_vm1, %v823_v52  ;;  %v953_v24 = vadd.f32 %v2245_v50, %v823_v52 }
 0x1fb   :  { %v736_v5 = vpop.f32.mrf.mxu1 }
 0x1fc   :  { %v985_v57 = vpack.c.bf16 %v953_v24, %v953_v24  ;;  %v1343_v23 = vsel %vm1247_vm3, %v953_v24, 0.0  ;;  %899 = vst [vmem:[%s2855_s9 + $0xf0] sm:$0xff] %v736_v5 }
 0x1fd   :  { %v1389_v58 = vsel %vm1361_vm4, %v1343_v23, 0.0  ;;  %v1445_v59 = vmul.f32 %v1343_v23, %v1343_v23 }
 0x1fe   :  { %v1390_v63 = vadd.f32 %v1389_v58, %v1388_v47  ;;  %1063 = vrot.lane.b32.xlu2 %v985_v57, %s1700_s17  ;;  %v1184_v47 = vadd.s32 152, %v2247_v53 }
 0x1ff   :  { %v1490_v0 = vsel %vm1361_vm4, %v1445_v59, 0.0 }
 0x200   :  { %v1491_v1 = vadd.f32 %v1490_v0, %v1489_v49  ;;  %v1036_v2 = vpop.permute.xlu0 %1035  ;;  %vm1252_vm9 = vcmp.lt.s32.totalorder %v1184_v47, %v2258_v54 }
 0x201   :  { %1132 = vst.msk [vmem:[%s2857_s10] sm:$0xf] %vm1131_vm2, %v1036_v2  ;;  %v825_v3 = vpop.f32.mrf.mxu2 }
 0x202   :  { %900 = vst.msk [vmem:[%s2855_s9 + $0xf8] sm:$0xff] %vm869_vm1, %v825_v3  ;;  %v954_v4 = vadd.f32 %v2245_v50, %v825_v3 }
 0x203   :  { %v739_v7 = vpop.f32.mrf.mxu1 }
 0x204   :  { %v986_v42 = vpack.c.bf16 %v954_v4, %v954_v4  ;;  %v1344_v8 = vsel %vm1248_vm5, %v954_v4, 0.0  ;;  %901 = vst [vmem:[%s2855_s9 + $0x100] sm:$0xff] %v739_v7 }
 0x205   :  { %v1391_v9 = vsel %vm1361_vm4, %v1344_v8, 0.0  ;;  %v1446_v29 = vmul.f32 %v1344_v8, %v1344_v8 }
 0x206   :  { %v1392_v13 = vadd.f32 %v1391_v9, %v1390_v63  ;;  %1065 = vrot.lane.b32.xlu0 %v986_v42, %s1700_s17  ;;  %847 = vmatmul.bf16.vlgmr.msra.gmra.mxu3 %v2384_v32  ;;  %v1185_v63 = vadd.s32 160, %v2247_v53 }
 0x207   :  { %v1492_v14 = vsel %vm1361_vm4, %v1446_v29, 0.0 }
 0x208   :  { %v1493_v15 = vadd.f32 %v1492_v14, %v1491_v1  ;;  %v1038_v40 = vpop.permute.xlu1 %1037  ;;  %vm1253_vm10 = vcmp.lt.s32.totalorder %v1185_v63, %v2258_v54 }
 0x209   :  { %1133 = vst.msk [vmem:[%s2857_s10 + $0x4] sm:$0xf] %vm1131_vm2, %v1038_v40  ;;  %v828_v28 = vpop.f32.mrf.mxu2 }
 0x20a   :  { %902 = vst.msk [vmem:[%s2855_s9 + $0x108] sm:$0xff] %vm869_vm1, %v828_v28  ;;  %v955_v48 = vadd.f32 %v2245_v50, %v828_v28 }
 0x20b   :  { %v741_v32 = vpop.f32.mrf.mxu1 }
 0x20c   :  { %v987_v17 = vpack.c.bf16 %v955_v48, %v955_v48  ;;  %v1345_v41 = vsel %vm1249_vm6, %v955_v48, 0.0  ;;  %903 = vst [vmem:[%s2855_s9 + $0x110] sm:$0xff] %v741_v32 }
 0x20d   :  { %v1393_v55 = vsel %vm1361_vm4, %v1345_v41, 0.0  ;;  %v1447_v62 = vmul.f32 %v1345_v41, %v1345_v41 }
 0x20e   :  { %v1394_v16 = vadd.f32 %v1393_v55, %v1392_v13  ;;  %1067 = vrot.lane.b32.xlu1 %v987_v17, %s1700_s17 }
 0x20f   :  { %v1494_v22 = vsel %vm1361_vm4, %v1447_v62, 0.0 }
 0x210   :  { %v1495_v25 = vadd.f32 %v1494_v22, %v1493_v15  ;;  %v1046_v11 = vpop.permute.xlu2 %1045 }
 0x211   :  { %1137 = vst.msk [vmem:[%s2857_s10 + $0x14] sm:$0xf] %vm1131_vm2, %v1046_v11  ;;  %v830_v26 = vpop.f32.mrf.mxu2 }
 0x212   :  { %904 = vst.msk [vmem:[%s2855_s9 + $0x118] sm:$0xff] %vm869_vm1, %v830_v26  ;;  %v956_v27 = vadd.f32 %v2245_v50, %v830_v26 }
 0x213   :  { %v744_v56 = vpop.f32.mrf.mxu1 }
 0x214   :  { %v988_v31 = vpack.c.bf16 %v956_v27, %v956_v27  ;;  %v1346_v33 = vsel %vm1250_vm7, %v956_v27, 0.0  ;;  %905 = vst [vmem:[%s2855_s9 + $0x120] sm:$0xff] %v744_v56 }
 0x215   :  { %v1395_v6 = vsel %vm1361_vm4, %v1346_v33, 0.0  ;;  %v1448_v34 = vmul.f32 %v1346_v33, %v1346_v33 }
 0x216   :  { %v1396_v19 = vadd.f32 %v1395_v6, %v1394_v16  ;;  %1069 = vrot.lane.b32.xlu2 %v988_v31, %s1700_s17  ;;  %852 = vmatmul.bf16.gmra.mxu3 %v2189_v20 }
 0x217   :  { %v1496_v35 = vsel %vm1361_vm4, %v1448_v34, 0.0  ;;  %v1188_v34 = vadd.s32 184, %v2247_v53 }
 0x218   :  { %v1497_v36 = vadd.f32 %v1496_v35, %v1495_v25  ;;  %v1042_v18 = vpop.permute.xlu0 %1041 }
 0x219   :  { %1135 = vst.msk [vmem:[%s2857_s10 + $0xc] sm:$0xf] %vm1131_vm2, %v1042_v18  ;;  %vm1256_vm13 = vcmp.lt.s32.totalorder %v1188_v34, %v2258_v54  ;;  %v1194_v34 = vadd.s32 232, %v2247_v53 }
 0x21a   :  { %v833_v38 = vpop.f32.mrf.mxu2 }
 0x21b   :  { %906 = vst.msk [vmem:[%s2855_s9 + $0x128] sm:$0xff] %vm869_vm1, %v833_v38  ;;  %v957_v20 = vadd.f32 %v2245_v50, %v833_v38  ;;  %v746_v39 = vpop.f32.mrf.mxu1  ;;  %vm1262_vm6 = vcmp.lt.s32.totalorder %v1194_v34, %v2258_v54 }
 0x21c   :  { %907 = vst [vmem:[%s2855_s9 + $0x130] sm:$0xff] %v746_v39 }
 0x21d   :  { %v989_v43 = vpack.c.bf16 %v957_v20, %v957_v20  ;;  %v1347_v44 = vsel %vm1251_vm8, %v957_v20, 0.0 }
 0x21e   :  { %v1397_v45 = vsel %vm1361_vm4, %v1347_v44, 0.0  ;;  %v1449_v46 = vmul.f32 %v1347_v44, %v1347_v44 }
 0x21f   :  { %v1398_v61 = vadd.f32 %v1397_v45, %v1396_v19  ;;  %1071 = vrot.lane.b32.xlu0 %v989_v43, %s1700_s17 }
 0x220   :  { %v1498_v49 = vsel %vm1361_vm4, %v1449_v46, 0.0  ;;  %v1044_v51 = vpop.permute.xlu1 %1043 }
 0x221   :  { %v1499_v52 = vadd.f32 %v1498_v49, %v1497_v36  ;;  %1136 = vst.msk [vmem:[%s2857_s10 + $0x10] sm:$0xf] %vm1131_vm2, %v1044_v51 }
 0x222   :  { %v835_v24 = vpop.f32.mrf.mxu2 }
 0x223   :  { %908 = vst.msk [vmem:[%s2855_s9 + $0x138] sm:$0xff] %vm869_vm1, %v835_v24  ;;  %v958_v5 = vadd.f32 %v2245_v50, %v835_v24  ;;  %v749_v57 = vpop.f32.mrf.mxu1 }
 0x224   :  { %909 = vst [vmem:[%s2855_s9 + $0x140] sm:$0xff] %v749_v57 }
 0x225   :  { %v990_v23 = vpack.c.bf16 %v958_v5, %v958_v5  ;;  %v1348_v58 = vsel %vm1252_vm9, %v958_v5, 0.0 }
 0x226   :  { %v1399_v59 = vsel %vm1361_vm4, %v1348_v58, 0.0  ;;  %v1450_v60 = vmul.f32 %v1348_v58, %v1348_v58  ;;  %857 = vmatmul.bf16.gmra.mxu3 %v2207_v30 }
 0x227   :  { %v1400_v0 = vadd.f32 %v1399_v59, %v1398_v61  ;;  %1073 = vrot.lane.b32.xlu1 %v990_v23, %s1700_s17 }
 0x228   :  { %v1500_v1 = vsel %vm1361_vm4, %v1450_v60, 0.0  ;;  %v1052_v2 = vpop.permute.xlu2 %1051 }
 0x229   :  { %v1501_v3 = vadd.f32 %v1500_v1, %v1499_v52  ;;  %1140 = vst.msk [vmem:[%s2857_s10 + $0x20] sm:$0xf] %vm1131_vm2, %v1052_v2 }
 0x22a   :  { %v838_v4 = vpop.f32.mrf.mxu2 }
 0x22b   :  { %910 = vst.msk [vmem:[%s2855_s9 + $0x148] sm:$0xff] %vm869_vm1, %v838_v4  ;;  %v959_v30 = vadd.f32 %v2245_v50, %v838_v4  ;;  %v751_v7 = vpop.f32.mrf.mxu1 }
 0x22c   :  { %911 = vst [vmem:[%s2855_s9 + $0x150] sm:$0xff] %v751_v7 }
 0x22d   :  { %v991_v42 = vpack.c.bf16 %v959_v30, %v959_v30  ;;  %v1349_v8 = vsel %vm1253_vm10, %v959_v30, 0.0 }
 0x22e   :  { %v1401_v9 = vsel %vm1361_vm4, %v1349_v8, 0.0  ;;  %v1451_v29 = vmul.f32 %v1349_v8, %v1349_v8 }
 0x22f   :  { %v1402_v13 = vadd.f32 %v1401_v9, %v1400_v0  ;;  %1075 = vrot.lane.b32.xlu2 %v991_v42, %s1700_s17 }
 0x230   :  { %v1502_v14 = vsel %vm1361_vm4, %v1451_v29, 0.0  ;;  %v1048_v15 = vpop.permute.xlu0 %1047 }
 0x231   :  { %v1503_v40 = vadd.f32 %v1502_v14, %v1501_v3  ;;  %1138 = vst.msk [vmem:[%s2857_s10 + $0x18] sm:$0xf] %vm1131_vm2, %v1048_v15 }
 0x232   :  { %v840_v28 = vpop.f32.mrf.mxu2 }
 0x233   :  { %912 = vst.msk [vmem:[%s2855_s9 + $0x158] sm:$0xff] %vm869_vm1, %v840_v28  ;;  %v960_v48 = vadd.f32 %v2245_v50, %v840_v28  ;;  %v754_v32 = vpop.f32.mrf.mxu1 }
 0x234   :  { %913 = vst [vmem:[%s2855_s9 + $0x160] sm:$0xff] %v754_v32 }
 0x235   :  { %v992_v17 = vpack.c.bf16 %v960_v48, %v960_v48  ;;  %v1350_v41 = vsel %vm1254_vm11, %v960_v48, 0.0 }
 0x236   :  { %v1403_v55 = vsel %vm1361_vm4, %v1350_v41, 0.0  ;;  %v1452_v62 = vmul.f32 %v1350_v41, %v1350_v41  ;;  %862 = vmatmul.bf16.gmra.mxu3 %v2225_v37  ;;  %v1189_v41 = vadd.s32 192, %v2247_v53 }
 0x237   :  { %v1404_v16 = vadd.f32 %v1403_v55, %v1402_v13  ;;  %1077 = vrot.lane.b32.xlu0 %v992_v17, %s1700_s17 }
 0x238   :  { %v1504_v22 = vsel %vm1361_vm4, %v1452_v62, 0.0  ;;  %v1050_v25 = vpop.permute.xlu1 %1049  ;;  %vm1257_vm14 = vcmp.lt.s32.totalorder %v1189_v41, %v2258_v54 }
 0x239   :  { %v1505_v11 = vadd.f32 %v1504_v22, %v1503_v40  ;;  %1139 = vst.msk [vmem:[%s2857_s10 + $0x1c] sm:$0xf] %vm1131_vm2, %v1050_v25  ;;  %v1191_v25 = vadd.s32 208, %v2247_v53 }
 0x23a   :  { %v843_v26 = vpop.f32.mrf.mxu2 }
 0x23b   :  { %914 = vst.msk [vmem:[%s2855_s9 + $0x168] sm:$0xff] %vm869_vm1, %v843_v26  ;;  %v961_v37 = vadd.f32 %v2245_v50, %v843_v26  ;;  %v756_v27 = vpop.f32.mrf.mxu1  ;;  %vm1259_vm0 = vcmp.lt.s32.totalorder %v1191_v25, %v2258_v54 }
 0x23c   :  { %915 = vst [vmem:[%s2855_s9 + $0x170] sm:$0xff] %v756_v27 }
 0x23d   :  { %v993_v56 = vpack.c.bf16 %v961_v37, %v961_v37  ;;  %v1351_v31 = vsel %vm1255_vm12, %v961_v37, 0.0  ;;  %v1193_v37 = vadd.s32 224, %v2247_v53 }
 0x23e   :  { %v1405_v33 = vsel %vm1361_vm4, %v1351_v31, 0.0  ;;  %v1453_v6 = vmul.f32 %v1351_v31, %v1351_v31 }
 0x23f   :  { %v1406_v19 = vadd.f32 %v1405_v33, %v1404_v16  ;;  %1079 = vrot.lane.b32.xlu1 %v993_v56, %s1700_s17  ;;  %v1190_v16 = vadd.s32 200, %v2247_v53  ;;  %vm1261_vm5 = vcmp.lt.s32.totalorder %v1193_v37, %v2258_v54 }
 0x240   :  { %v1506_v12 = vsel %vm1361_vm4, %v1453_v6, 0.0  ;;  %v1058_v35 = vpop.permute.xlu2 %1057 }
 0x241   :  { %v1507_v36 = vadd.f32 %v1506_v12, %v1505_v11  ;;  %1143 = vst.msk [vmem:[%s2857_s10 + $0x2c] sm:$0xf] %vm1131_vm2, %v1058_v35  ;;  %vm1258_vm15 = vcmp.lt.s32.totalorder %v1190_v16, %v2258_v54  ;;  %v1192_v11 = vadd.s32 216, %v2247_v53 }
 0x242   :  { %v845_v18 = vpop.f32.mrf.mxu2 }
 0x243   :  { %916 = vst.msk [vmem:[%s2855_s9 + $0x178] sm:$0xff] %vm869_vm1, %v845_v18  ;;  %v962_v38 = vadd.f32 %v2245_v50, %v845_v18  ;;  %vm1260_vm3 = vcmp.lt.s32.totalorder %v1192_v11, %v2258_v54  ;;  %v1195_v18 = vadd.s32 240, %v2247_v53 }
 0x245   :  { %v994_v20 = vpack.c.bf16 %v962_v38, %v962_v38  ;;  %v1352_v39 = vsel %vm1256_vm13, %v962_v38, 0.0  ;;  %vm1263_vm7 = vcmp.lt.s32.totalorder %v1195_v18, %v2258_v54 }
 0x246   :  { %v1407_v43 = vsel %vm1361_vm4, %v1352_v39, 0.0  ;;  %v1454_v44 = vmul.f32 %v1352_v39, %v1352_v39 }
 0x247   :  { %v2643_v45 = vadd.f32 %v1407_v43, %v1406_v19  ;;  %1081 = vrot.lane.b32.xlu2 %v994_v20, %s1700_s17 }
 0x248   :  { %v1508_v46 = vsel %vm1361_vm4, %v1454_v44, 0.0  ;;  %v1054_v47 = vpop.permute.xlu0 %1053 }
 0x249   :  { %v2647_v61 = vadd.f32 %v1508_v46, %v1507_v36  ;;  %1141 = vst.msk [vmem:[%s2857_s10 + $0x24] sm:$0xf] %vm1131_vm2, %v1054_v47  ;;  %v759_v49 = vpop.f32.mrf.mxu3 }
 0x24a   :  { %917 = vst [vmem:[%s2855_s9 + $0x180] sm:$0xff] %v759_v49 }
 0x250   :  { %v1056_v51 = vpop.permute.xlu1 %1055 }
 0x251   :  { %1142 = vst.msk [vmem:[%s2857_s10 + $0x28] sm:$0xf] %vm1131_vm2, %v1056_v51  ;;  %v761_v52 = vpop.f32.mrf.mxu3 }
 0x252   :  { %919 = vst [vmem:[%s2855_s9 + $0x190] sm:$0xff] %v761_v52 }
 0x258   :  { %v1064_v24 = vpop.permute.xlu2 %1063 }
 0x259   :  { %1146 = vst.msk [vmem:[%s2857_s10 + $0x38] sm:$0xf] %vm1131_vm2, %v1064_v24  ;;  %v764_v5 = vpop.f32.mrf.mxu3 }
 0x25a   :  { %921 = vst [vmem:[%s2855_s9 + $0x1a0] sm:$0xff] %v764_v5 }
 0x260   :  { %v1060_v57 = vpop.permute.xlu0 %1059 }
 0x261   :  { %1144 = vst.msk [vmem:[%s2857_s10 + $0x30] sm:$0xf] %vm1131_vm2, %v1060_v57  ;;  %v766_v23 = vpop.f32.mrf.mxu3 }
 0x262   :  { %923 = vst [vmem:[%s2855_s9 + $0x1b0] sm:$0xff] %v766_v23 }
 0x268   :  { %v1062_v58 = vpop.permute.xlu1 %1061 }
 0x269   :  { %1145 = vst.msk [vmem:[%s2857_s10 + $0x34] sm:$0xf] %vm1131_vm2, %v1062_v58  ;;  %v769_v59 = vpop.f32.mrf.mxu3 }
 0x26a   :  { %925 = vst [vmem:[%s2855_s9 + $0x1c0] sm:$0xff] %v769_v59 }
 0x270   :  { %v1070_v60 = vpop.permute.xlu2 %1069 }
 0x271   :  { %1149 = vst.msk [vmem:[%s2857_s10 + $0x44] sm:$0xf] %vm1131_vm2, %v1070_v60  ;;  %v771_v63 = vpop.f32.mrf.mxu3 }
 0x272   :  { %927 = vst [vmem:[%s2855_s9 + $0x1d0] sm:$0xff] %v771_v63 }
 0x278   :  { %v1066_v0 = vpop.permute.xlu0 %1065 }
 0x279   :  { %1147 = vst.msk [vmem:[%s2857_s10 + $0x3c] sm:$0xf] %vm1131_vm2, %v1066_v0  ;;  %v774_v1 = vpop.f32.mrf.mxu3 }
 0x27a   :  { %929 = vst [vmem:[%s2855_s9 + $0x1e0] sm:$0xff] %v774_v1 }
 0x280   :  { %v1068_v2 = vpop.permute.xlu1 %1067 }
 0x281   :  { %1148 = vst.msk [vmem:[%s2857_s10 + $0x40] sm:$0xf] %vm1131_vm2, %v1068_v2  ;;  %v776_v3 = vpop.f32.mrf.mxu3 }
 0x282   :  { %931 = vst [vmem:[%s2855_s9 + $0x1f0] sm:$0xff] %v776_v3 }
 0x289   :  { %v1076_v4 = vpop.permute.xlu2 %1075  ;;  %v848_v30 = vpop.f32.mrf.mxu3 }
 0x28a   :  { %1152 = vst.msk [vmem:[%s2857_s10 + $0x50] sm:$0xf] %vm1131_vm2, %v1076_v4  ;;  %v963_v7 = vadd.f32 %v2245_v50, %v848_v30  ;;  %v1196_v4 = vadd.s32 248, %v2247_v53 }
 0x28b   :  { %918 = vst.msk [vmem:[%s2855_s9 + $0x188] sm:$0xff] %vm869_vm1, %v848_v30 }
 0x28c   :  { %v995_v42 = vpack.c.bf16 %v963_v7, %v963_v7  ;;  %v1353_v26 = vsel %vm1257_vm14, %v963_v7, 0.0  ;;  %vm1264_vm8 = vcmp.lt.s32.totalorder %v1196_v4, %v2258_v54 }
 0x28d   :  { %v1455_v6 = vmul.f32 %v1353_v26, %v1353_v26  ;;  %v1409_v35 = vsel %vm1361_vm4, %v1353_v26, 0.0 }
 0x28e   :  { %1083 = vrot.lane.b32.xlu0 %v995_v42, %s1700_s17  ;;  %v1410_v44 = vadd.f32 %v1409_v35, %v2643_v45 }
 0x28f   :  { %v1510_v20 = vsel %vm1361_vm4, %v1455_v6, 0.0 }
 0x290   :  { %v1511_v24 = vadd.f32 %v1510_v20, %v2647_v61 }
 0x291   :  { %v1072_v8 = vpop.permute.xlu0 %1071  ;;  %v850_v9 = vpop.f32.mrf.mxu3 }
 0x292   :  { %1150 = vst.msk [vmem:[%s2857_s10 + $0x48] sm:$0xf] %vm1131_vm2, %v1072_v8  ;;  %v964_v29 = vadd.f32 %v2245_v50, %v850_v9 }
 0x293   :  { %920 = vst.msk [vmem:[%s2855_s9 + $0x198] sm:$0xff] %vm869_vm1, %v850_v9 }
 0x294   :  { %v996_v10 = vpack.c.bf16 %v964_v29, %v964_v29  ;;  %v1354_v31 = vsel %vm1258_vm15, %v964_v29, 0.0 }
 0x295   :  { %v1456_v36 = vmul.f32 %v1354_v31, %v1354_v31  ;;  %v1411_v39 = vsel %vm1361_vm4, %v1354_v31, 0.0 }
 0x296   :  { %1085 = vrot.lane.b32.xlu1 %v996_v10, %s1700_s17  ;;  %v1412_v5 = vadd.f32 %v1411_v39, %v1410_v44 }
 0x297   :  { %v1512_v47 = vsel %vm1361_vm4, %v1456_v36, 0.0 }
 0x298   :  { %v1513_v60 = vadd.f32 %v1512_v47, %v1511_v24 }
 0x299   :  { %v1074_v13 = vpop.permute.xlu1 %1073  ;;  %v853_v14 = vpop.f32.mrf.mxu3 }
 0x29a   :  { %1151 = vst.msk [vmem:[%s2857_s10 + $0x4c] sm:$0xf] %vm1131_vm2, %v1074_v13  ;;  %v965_v15 = vadd.f32 %v2245_v50, %v853_v14 }
 0x29b   :  { %922 = vst.msk [vmem:[%s2855_s9 + $0x1a8] sm:$0xff] %vm869_vm1, %v853_v14 }
 0x29c   :  { %v997_v40 = vpack.c.bf16 %v965_v15, %v965_v15  ;;  %v1355_v19 = vsel %vm1259_vm0, %v965_v15, 0.0 }
 0x29d   :  { %v1457_v43 = vmul.f32 %v1355_v19, %v1355_v19  ;;  %v1413_v49 = vsel %vm1361_vm4, %v1355_v19, 0.0 }
 0x29e   :  { %1087 = vrot.lane.b32.xlu2 %v997_v40, %s1700_s17  ;;  %v1414_v63 = vadd.f32 %v1413_v49, %v1412_v5 }
 0x29f   :  { %v1514_v23 = vsel %vm1361_vm4, %v1457_v43, 0.0 }
 0x2a0   :  { %v1515_v30 = vadd.f32 %v1514_v23, %v1513_v60 }
 0x2a1   :  { %v1082_v28 = vpop.permute.xlu2 %1081  ;;  %v855_v48 = vpop.f32.mrf.mxu3 }
 0x2a2   :  { %1155 = vst.msk [vmem:[%s2857_s10 + $0x5c] sm:$0xf] %vm1131_vm2, %v1082_v28  ;;  %v966_v32 = vadd.f32 %v2245_v50, %v855_v48 }
 0x2a3   :  { %924 = vst.msk [vmem:[%s2855_s9 + $0x1b8] sm:$0xff] %vm869_vm1, %v855_v48 }
 0x2a4   :  { %v998_v17 = vpack.c.bf16 %v966_v32, %v966_v32  ;;  %v1356_v38 = vsel %vm1260_vm3, %v966_v32, 0.0 }
 0x2a5   :  { %v1458_v51 = vmul.f32 %v1356_v38, %v1356_v38  ;;  %v1415_v58 = vsel %vm1361_vm4, %v1356_v38, 0.0 }
 0x2a6   :  { %1089 = vrot.lane.b32.xlu0 %v998_v17, %s1700_s17  ;;  %v1416_v7 = vadd.f32 %v1415_v58, %v1414_v63 }
 0x2a7   :  { %v1516_v61 = vsel %vm1361_vm4, %v1458_v51, 0.0 }
 0x2a8   :  { %v1517_v29 = vadd.f32 %v1516_v61, %v1515_v30 }
 0x2a9   :  { %v1078_v55 = vpop.permute.xlu0 %1077  ;;  %v858_v62 = vpop.f32.mrf.mxu3 }
 0x2aa   :  { %1153 = vst.msk [vmem:[%s2857_s10 + $0x54] sm:$0xf] %vm1131_vm2, %v1078_v55  ;;  %v967_v21 = vadd.f32 %v2245_v50, %v858_v62 }
 0x2ab   :  { %926 = vst.msk [vmem:[%s2855_s9 + $0x1c8] sm:$0xff] %vm869_vm1, %v858_v62 }
 0x2ac   :  { %v999_v22 = vpack.c.bf16 %v967_v21, %v967_v21  ;;  %v1357_v46 = vsel %vm1261_vm5, %v967_v21, 0.0 }
 0x2ad   :  { %v1459_v59 = vmul.f32 %v1357_v46, %v1357_v46  ;;  %v1417_v2 = vsel %vm1361_vm4, %v1357_v46, 0.0 }
 0x2ae   :  { %1091 = vrot.lane.b32.xlu1 %v999_v22, %s1700_s17  ;;  %v1418_v10 = vadd.f32 %v1417_v2, %v1416_v7 }
 0x2af   :  { %v1518_v42 = vsel %vm1361_vm4, %v1459_v59, 0.0 }
 0x2b0   :  { %v1519_v40 = vadd.f32 %v1518_v42, %v1517_v29 }
 0x2b1   :  { %v1080_v27 = vpop.permute.xlu1 %1079  ;;  %v860_v56 = vpop.f32.mrf.mxu3 }
 0x2b2   :  { %1154 = vst.msk [vmem:[%s2857_s10 + $0x58] sm:$0xf] %vm1131_vm2, %v1080_v27  ;;  %v968_v33 = vadd.f32 %v2245_v50, %v860_v56 }
 0x2b3   :  { %928 = vst.msk [vmem:[%s2855_s9 + $0x1d8] sm:$0xff] %vm869_vm1, %v860_v56 }
 0x2b4   :  { %v1000_v12 = vpack.c.bf16 %v968_v33, %v968_v33  ;;  %v1358_v57 = vsel %vm1262_vm6, %v968_v33, 0.0 }
 0x2b5   :  { %v1460_v3 = vmul.f32 %v1358_v57, %v1358_v57  ;;  %v1419_v8 = vsel %vm1361_vm4, %v1358_v57, 0.0 }
 0x2b6   :  { %1093 = vrot.lane.b32.xlu2 %v1000_v12, %s1700_s17  ;;  %v1420_v53 = vadd.f32 %v1419_v8, %v1418_v10 }
 0x2b7   :  { %v1520_v13 = vsel %vm1361_vm4, %v1460_v3, 0.0 }
 0x2b8   :  { %v1521_v32 = vadd.f32 %v1520_v13, %v1519_v40 }
 0x2b9   :  { %v863_v52 = vpop.f32.mrf.mxu3 }
 0x2ba   :  { %930 = vst.msk [vmem:[%s2855_s9 + $0x1e8] sm:$0xff] %vm869_vm1, %v863_v52  ;;  %v969_v45 = vadd.f32 %v2245_v50, %v863_v52 }
 0x2bc   :  { %v1001_v0 = vpack.c.bf16 %v969_v45, %v969_v45  ;;  %v1359_v1 = vsel %vm1263_vm7, %v969_v45, 0.0 }
 0x2bd   :  { %v1461_v9 = vmul.f32 %v1359_v1, %v1359_v1  ;;  %v1421_v14 = vsel %vm1361_vm4, %v1359_v1, 0.0 }
 0x2be   :  { %1095 = vrot.lane.b32.xlu0 %v1001_v0, %s1700_s17  ;;  %v1422_v17 = vadd.f32 %v1421_v14, %v1420_v53 }
 0x2bf   :  { %v1522_v48 = vsel %vm1361_vm4, %v1461_v9, 0.0 }
 0x2c0   :  { %v1523_v16 = vadd.f32 %v1522_v48, %v1521_v32 }
 0x2c1   :  { %v865_v15 = vpop.f32.mrf.mxu3 }
 0x2c2   :  { %932 = vst.msk [vmem:[%s2855_s9 + $0x1f8] sm:$0xff] %vm869_vm1, %v865_v15  ;;  %v970_v28 = vadd.f32 %v2245_v50, %v865_v15  ;;  %vm1532_vm1 = vcmask 1040384  }
 0x2c4   :  { %v1002_v41 = vpack.c.bf16 %v970_v28, %v970_v28  ;;  %v1360_v55 = vsel %vm1264_vm8, %v970_v28, 0.0 }
 0x2c5   :  { %v1423_v62 = vsel %vm1361_vm4, %v1360_v55, 0.0  ;;  %v1462_v21 = vmul.f32 %v1360_v55, %v1360_v55 }
 0x2c6   :  { %v1424_v54 = vadd.f32 %v1423_v62, %v1422_v17  ;;  %1097 = vrot.lane.b32.xlu1 %v1002_v41, %s1700_s17 }
 0x2c7   :  { %v1524_v22 = vsel %vm1361_vm4, %v1462_v21, 0.0  ;;  %vm1538_vm4 = vcmask 254976  }
 0x2c8   :  { %v1425_v25 = vrot.slane %v1424_v54, 4  ;;  %v1525_v11 = vadd.f32 %v1524_v22, %v1523_v16 }
 0x2ca   :  { %v1426_v26 = vadd.f32 %v1425_v25, %v1424_v54  ;;  %v1526_v37 = vrot.slane %v1525_v11, 4 }
 0x2cc   :  { %v1427_v50 = vrot.slane %v1426_v26, 2  ;;  %v1527_v27 = vadd.f32 %v1526_v37, %v1525_v11 }
 0x2ce   :  { %v1428_v56 = vadd.f32 %v1427_v50, %v1426_v26  ;;  %v1528_v31 = vrot.slane %v1527_v27, 2 }
 0x2d0   :  { %v1429_v33 = vrot.slane %v1428_v56, 1  ;;  %v1529_v6 = vadd.f32 %v1528_v31, %v1527_v27 }
 0x2d2   :  { %v1530_v34 = vrot.slane %v1529_v6, 1  ;;  %v1430_v19 = vadd.f32 %v1429_v33, %v1428_v56 }
 0x2d4   :  { %v1531_v12 = vadd.f32 %v1530_v34, %v1529_v6 }
 0x2d6   :  { %v1533_v35 = vsel %vm1532_vm1, %v1430_v19, %v1531_v12 }
 0x2d7   :  { %1535 = vrot.lane.b32.xlu2 %v1533_v35, %s1700_s17 }
 0x2f8   :  { %v1088_v36 = vpop.permute.xlu2 %1087 }
 0x2f9   :  { %1158 = vst.msk [vmem:[%s2857_s10 + $0x68] sm:$0xf] %vm1131_vm2, %v1088_v36 }
 0x300   :  { %v1084_v18 = vpop.permute.xlu0 %1083 }
 0x301   :  { %1156 = vst.msk [vmem:[%s2857_s10 + $0x60] sm:$0xf] %vm1131_vm2, %v1084_v18 }
 0x308   :  { %v1086_v38 = vpop.permute.xlu1 %1085 }
 0x309   :  { %1157 = vst.msk [vmem:[%s2857_s10 + $0x64] sm:$0xf] %vm1131_vm2, %v1086_v38 }
 0x310   :  { %v1094_v20 = vpop.permute.xlu2 %1093 }
 0x311   :  { %1161 = vst.msk [vmem:[%s2857_s10 + $0x74] sm:$0xf] %vm1131_vm2, %v1094_v20 }
 0x318   :  { %v1090_v39 = vpop.permute.xlu0 %1089 }
 0x319   :  { %1159 = vst.msk [vmem:[%s2857_s10 + $0x6c] sm:$0xf] %vm1131_vm2, %v1090_v39 }
 0x320   :  { %v1092_v43 = vpop.permute.xlu1 %1091 }
 0x321   :  { %1160 = vst.msk [vmem:[%s2857_s10 + $0x70] sm:$0xf] %vm1131_vm2, %v1092_v43 }
 0x330   :  { %v1096_v44 = vpop.permute.xlu0 %1095 }
 0x331   :  { %1162 = vst.msk [vmem:[%s2857_s10 + $0x78] sm:$0xf] %vm1131_vm2, %v1096_v44  ;;  %v1536_v46 = vpop.permute.xlu2 %1535 }
 0x332   :  { %1539 = vst.msk [vmem:[%s2858_s11] sm:$0x3] %vm1538_vm4, %v1536_v46 }
 0x338   :  { %v1098_v47 = vpop.permute.xlu1 %1097 }
 0x339   :  { %1163 = vst.msk [vmem:[%s2857_s10 + $0x7c] sm:$0xf] %vm1131_vm2, %v1098_v47 }

</bundles_post_ra>
